<compile_context>
chip_gen: v6e
topology: v6e:2x2x1
jax: 0.10.0
libtpu: 0.0.40
codegen_flags: <defaults>
</compile_context>

<pallas_src>
import functools

import jax
import jax.numpy as jnp
from jax.experimental import pallas as pl
from jax.experimental.pallas import tpu as pltpu

# --- model hyperparameters (the globals the PyTorch module references) ---
engDictLen = 30
chiDictLen = 20
embedLen   = 16
hiddenNum  = 32


# ---------------------------------------------------------------------------
# In-kernel helper: T unrolled LSTM steps (PyTorch gate order i, f, g, o).
# gx : (T*B, 4H) value  -- precomputed x @ W_ih^T + (b_ih + b_hh), time-major rows
# whh: (H, 4H)   value  -- W_hh pre-transposed
# h,c: (B, H)    values -- running state
# out_ref (optional): (T*B, H) VMEM ref; per-step h is stashed into rows [t*B,(t+1)*B)
# ---------------------------------------------------------------------------
def _lstm_unrolled(gx, whh, h, c, T, B, H, out_ref=None):
    for t in range(T):
        # single MXU op per step on the serial path (input projection was hoisted)
        gates = gx[t * B:(t + 1) * B, :] + jnp.dot(
            h, whh, preferred_element_type=jnp.float32)          # (B, 4H)
        i_g = jax.nn.sigmoid(gates[:, 0 * H:1 * H])
        f_g = jax.nn.sigmoid(gates[:, 1 * H:2 * H])
        g_g = jnp.tanh(gates[:, 2 * H:3 * H])
        o_g = jax.nn.sigmoid(gates[:, 3 * H:4 * H])
        c = f_g * c + i_g * g_g
        h = o_g * jnp.tanh(c)
        if out_ref is not None:
            out_ref[t * B:(t + 1) * B, :] = h
    return h, c


# ---------------------------------------------------------------------------
# Fused kernel: embeddings + encoder LSTM + decoder LSTM + classifier + CE (mean)
# ---------------------------------------------------------------------------
def seq2seq_ce_kernel(ids_e_ref, ids_d_ref, tgt_ref,
                      emb_eng_ref, emb_chi_ref,
                      enc_wih_ref, enc_whh_ref, enc_b_ref,
                      dec_wih_ref, dec_whh_ref, dec_b_ref,
                      cls_w_ref, cls_b_ref,
                      loss_ref, hs_scr, *, B, Te, Td, H, Ve, Vc):
    # In-kernel embedding lookup as a one-hot MXU matmul (no XLA gather, no HBM
    # relayout of the embedded activations).
    def embed(ids_ref, emb_ref, n, vocab):
        lane = jax.lax.broadcasted_iota(jnp.int32, (n, vocab), 1)
        onehot = jnp.where(lane == ids_ref[...], 1.0, 0.0).astype(jnp.float32)
        return jnp.dot(onehot, emb_ref[...], preferred_element_type=jnp.float32)

    xe = embed(ids_e_ref, emb_eng_ref, Te * B, Ve)               # (Te*B, E) time-major
    xd = embed(ids_d_ref, emb_chi_ref, Td * B, Vc)               # (Td*B, E) time-major

    # Hoisted input projections: one (T*B, E) @ (E, 4H) matmul per LSTM instead of
    # one tiny matmul per timestep.
    gx_enc = jnp.dot(xe, enc_wih_ref[...],
                     preferred_element_type=jnp.float32) + enc_b_ref[...]
    gx_dec = jnp.dot(xd, dec_wih_ref[...],
                     preferred_element_type=jnp.float32) + dec_b_ref[...]

    h0 = jnp.zeros((B, H), jnp.float32)
    c0 = jnp.zeros((B, H), jnp.float32)

    # Encoder recurrence (only the final state is needed).
    hT, cT = _lstm_unrolled(gx_enc, enc_whh_ref[...], h0, c0, Te, B, H)

    # Decoder recurrence seeded with encoder final state; per-step hidden states
    # are stashed in VMEM scratch (never written to HBM).
    _lstm_unrolled(gx_dec, dec_whh_ref[...], hT, cT, Td, B, H, out_ref=hs_scr)

    # Classifier on all Td*B tokens at once + cross-entropy (mean).
    hs = hs_scr[...]                                             # (Td*B, H) time-major
    logits = jnp.dot(hs, cls_w_ref[...],
                     preferred_element_type=jnp.float32) + cls_b_ref[...]   # (N, C)
    m = jnp.max(logits, axis=-1, keepdims=True)
    lse = m + jnp.log(jnp.sum(jnp.exp(logits - m), axis=-1, keepdims=True))
    cls_ids = jax.lax.broadcasted_iota(jnp.int32, logits.shape, 1)
    sel = jnp.sum(jnp.where(cls_ids == tgt_ref[...], logits, 0.0),
                  axis=-1, keepdims=True)                        # target-class logit
    loss_ref[...] = jnp.mean(lse - sel).reshape(1, 1)


def seq2seq_ce(ids_e, ids_d, tgt, emb_eng, emb_chi,
               enc_wih_t, enc_whh_t, enc_b,
               dec_wih_t, dec_whh_t, dec_b,
               cls_w_t, cls_b, *, B, Te, Td):
    """Single pallas_call for the whole training forward. Returns scalar CE loss."""
    H = enc_whh_t.shape[0]
    Ve, Vc = emb_eng.shape[0], emb_chi.shape[0]
    kernel = functools.partial(seq2seq_ce_kernel,
                               B=B, Te=Te, Td=Td, H=H, Ve=Ve, Vc=Vc)
    vmem_specs = [pl.BlockSpec(memory_space=pltpu.MemorySpace.VMEM)
                  for _ in range(13)]
    out = pl.pallas_call(
        kernel,
        out_shape=jax.ShapeDtypeStruct((1, 1), jnp.float32),
        in_specs=vmem_specs,
        out_specs=pl.BlockSpec(memory_space=pltpu.MemorySpace.VMEM),
        scratch_shapes=[pltpu.VMEM((Td * B, H), jnp.float32)],
    )(ids_e, ids_d, tgt, emb_eng, emb_chi,
      enc_wih_t, enc_whh_t, enc_b,
      dec_wih_t, dec_whh_t, dec_b, cls_w_t, cls_b)
    return out[0, 0]


# ---------------------------------------------------------------------------
# Parameter construction (deterministic, PyTorch layout)
# ---------------------------------------------------------------------------
def init_params(key):
    ks = jax.random.split(key, 12)
    u = lambda k, shp: jax.random.uniform(k, shp, jnp.float32, -0.1, 0.1)
    H, E, C = hiddenNum, embedLen, chiDictLen
    return dict(
        emb_eng=u(ks[0], (engDictLen, E)),
        emb_chi=u(ks[1], (chiDictLen, E)),
        # encoder LSTM (PyTorch layout: W_ih (4H,E), W_hh (4H,H), biases (4H,))
        enc_wih=u(ks[2], (4 * H, E)), enc_whh=u(ks[3], (4 * H, H)),
        enc_bih=u(ks[4], (4 * H,)),   enc_bhh=u(ks[5], (4 * H,)),
        # decoder LSTM
        dec_wih=u(ks[6], (4 * H, E)), dec_whh=u(ks[7], (4 * H, H)),
        dec_bih=u(ks[8], (4 * H,)),   dec_bhh=u(ks[9], (4 * H,)),
        # decoder classifier (Decoder.cls): Linear(H, chiDictLen)
        cls_w=u(ks[10], (C, H)), cls_b=u(ks[11], (C,)),
    )


def my_model_forward(params, batchEng, batchChi):
    """Training path of MyModel.forward (batchChi is not None) -> scalar CE loss."""
    B, Te = batchEng.shape
    Td = batchChi.shape[1] - 1

    # Only tiny int32 relayouts happen outside the kernel: time-major flatten so
    # that row (t*B + b) <-> token (b, t).  All float work is inside the kernel.
    ids_e = batchEng.T.reshape(Te * B, 1).astype(jnp.int32)
    ids_d = batchChi[:, :-1].T.reshape(Td * B, 1).astype(jnp.int32)
    tgt   = batchChi[:, 1:].T.reshape(Td * B, 1).astype(jnp.int32)

    # Param-only preprocessing (tiny): pre-transpose weights, pre-sum biases and
    # zero-pad embedding-table vocab to a sublane (8) multiple so the in-kernel
    # one-hot contraction is aligned.  One-hot columns >= real vocab are never hit.
    pad8 = lambda t: jnp.pad(t, ((0, (-t.shape[0]) % 8), (0, 0)))
    emb_eng_p = pad8(params['emb_eng'])
    emb_chi_p = pad8(params['emb_chi'])
    enc_bias = (params['enc_bih'] + params['enc_bhh']).reshape(1, -1)
    dec_bias = (params['dec_bih'] + params['dec_bhh']).reshape(1, -1)

    return seq2seq_ce(
        ids_e, ids_d, tgt, emb_eng_p, emb_chi_p,
        params['enc_wih'].T, params['enc_whh'].T, enc_bias,
        params['dec_wih'].T, params['dec_whh'].T, dec_bias,
        params['cls_w'].T, params['cls_b'].reshape(1, -1),
        B=B, Te=Te, Td=Td)


# ---------------------------------------------------------------------------
# Pure-JAX reference (for correctness check)
# ---------------------------------------------------------------------------
def _lstm_ref(x_bte, wih, whh, bih, bhh, h, c):
    B, T, E = x_bte.shape
    H = h.shape[-1]
    hs = []
    for t in range(T):
        g = x_bte[:, t] @ wih.T + h @ whh.T + bih + bhh
        i = jax.nn.sigmoid(g[:, :H]);       f = jax.nn.sigmoid(g[:, H:2 * H])
        gg = jnp.tanh(g[:, 2 * H:3 * H]);   o = jax.nn.sigmoid(g[:, 3 * H:])
        c = f * c + i * gg
        h = o * jnp.tanh(c)
        hs.append(h)
    return jnp.stack(hs, axis=1), h, c


def _forward_ref(p, batchEng, batchChi):
    B = batchEng.shape[0]
    H = hiddenNum
    h0 = jnp.zeros((B, H)); c0 = jnp.zeros((B, H))
    _, hT, cT = _lstm_ref(p['emb_eng'][batchEng], p['enc_wih'], p['enc_whh'],
                          p['enc_bih'], p['enc_bhh'], h0, c0)
    hs, _, _ = _lstm_ref(p['emb_chi'][batchChi[:, :-1]], p['dec_wih'], p['dec_whh'],
                         p['dec_bih'], p['dec_bhh'], hT, cT)
    logits = hs @ p['cls_w'].T + p['cls_b']                  # (B, Td, C)
    logits = logits.reshape(-1, chiDictLen)
    tgt = batchChi[:, 1:].reshape(-1)
    logp = jax.nn.log_softmax(logits, axis=-1)
    return -jnp.mean(logp[jnp.arange(tgt.shape[0]), tgt])


# ---------------------------------------------------------------------------
if __name__ == "__main__":
    key = jax.random.PRNGKey(0)
    kp, ke, kc = jax.random.split(key, 3)

    params = init_params(kp)

    B, T_eng, T_chi = 2, 8, 9
    batchEng = jax.random.randint(ke, (B, T_eng), 0, engDictLen, dtype=jnp.int32)
    batchChi = jax.random.randint(kc, (B, T_chi), 0, chiDictLen, dtype=jnp.int32)

    loss = jax.jit(my_model_forward)(params, batchEng, batchChi)
    loss = jax.block_until_ready(loss)

    loss_ref = _forward_ref(params, batchEng, batchChi)
    assert jnp.allclose(loss, loss_ref, atol=1e-4, rtol=1e-4), (loss, loss_ref)

    # TODO(synk): greedy-decoding inference branch (batchChi is None) is host-driven
    #             python control flow over argmax + index2chi lookup; not a kernel.
    print("KERNEL_OK")
</pallas_src>

<mosaic_0001>
module attributes {stable_mosaic.version = 11 : i64} {
  func.func @seq2seq_ce_kernel(%arg0: memref<16x1xi32, #tpu.memory_space<vmem>>, %arg1: memref<16x1xi32, #tpu.memory_space<vmem>>, %arg2: memref<16x1xi32, #tpu.memory_space<vmem>>, %arg3: memref<32x16xf32, #tpu.memory_space<vmem>>, %arg4: memref<24x16xf32, #tpu.memory_space<vmem>>, %arg5: memref<16x128xf32, #tpu.memory_space<vmem>>, %arg6: memref<32x128xf32, #tpu.memory_space<vmem>>, %arg7: memref<1x128xf32, #tpu.memory_space<vmem>>, %arg8: memref<16x128xf32, #tpu.memory_space<vmem>>, %arg9: memref<32x128xf32, #tpu.memory_space<vmem>>, %arg10: memref<1x128xf32, #tpu.memory_space<vmem>>, %arg11: memref<32x20xf32, #tpu.memory_space<vmem>>, %arg12: memref<1x20xf32, #tpu.memory_space<vmem>>, %arg13: memref<1x1xf32, #tpu.memory_space<vmem>>, %arg14: memref<16x32xf32, #tpu.memory_space<vmem>>) attributes {dimension_semantics = [], scalar_prefetch = 0 : i64, scratch_operands = 1 : i64, tpu.core_type = #tpu.core_type<tc>} {
    %0 = tpu.iota {dimensions = array<i32: 1>} : vector<16x32xi32>
    %c0 = arith.constant 0 : index
    %c0_0 = arith.constant 0 : index
    %1 = vector.load %arg0[%c0, %c0_0] : memref<16x1xi32, #tpu.memory_space<vmem>>, vector<16x1xi32>
    %2 = vector.broadcast %1 : vector<16x1xi32> to vector<16x32xi32>
    %3 = arith.cmpi eq, %0, %2 : vector<16x32xi32>
    %cst = arith.constant 1.000000e+00 : f32
    %cst_1 = arith.constant 0.000000e+00 : f32
    %4 = vector.broadcast %cst : f32 to vector<16x32xf32>
    %5 = vector.broadcast %cst_1 : f32 to vector<16x32xf32>
    %6 = arith.select %3, %4, %5 : vector<16x32xi1>, vector<16x32xf32>
    %c0_2 = arith.constant 0 : index
    %c0_3 = arith.constant 0 : index
    %7 = vector.load %arg3[%c0_2, %c0_3] : memref<32x16xf32, #tpu.memory_space<vmem>>, vector<32x16xf32>
    %cst_4 = arith.constant dense<0.000000e+00> : vector<16x16xf32>
    %8 = tpu.matmul %6, %7, %cst_4 {dimension_numbers = #tpu.dot_dimension_numbers<[1], [0], [0], [1], [0, 0, 1, 1], [], []>} : vector<16x32xf32>, vector<32x16xf32>, vector<16x16xf32> -> vector<16x16xf32>
    %9 = tpu.iota {dimensions = array<i32: 1>} : vector<16x24xi32>
    %c0_5 = arith.constant 0 : index
    %c0_6 = arith.constant 0 : index
    %10 = vector.load %arg1[%c0_5, %c0_6] : memref<16x1xi32, #tpu.memory_space<vmem>>, vector<16x1xi32>
    %11 = vector.broadcast %10 : vector<16x1xi32> to vector<16x24xi32>
    %12 = arith.cmpi eq, %9, %11 : vector<16x24xi32>
    %cst_7 = arith.constant 1.000000e+00 : f32
    %cst_8 = arith.constant 0.000000e+00 : f32
    %13 = vector.broadcast %cst_7 : f32 to vector<16x24xf32>
    %14 = vector.broadcast %cst_8 : f32 to vector<16x24xf32>
    %15 = arith.select %12, %13, %14 : vector<16x24xi1>, vector<16x24xf32>
    %c0_9 = arith.constant 0 : index
    %c0_10 = arith.constant 0 : index
    %16 = vector.load %arg4[%c0_9, %c0_10] : memref<24x16xf32, #tpu.memory_space<vmem>>, vector<24x16xf32>
    %cst_11 = arith.constant dense<0.000000e+00> : vector<16x16xf32>
    %17 = tpu.matmul %15, %16, %cst_11 {dimension_numbers = #tpu.dot_dimension_numbers<[1], [0], [0], [1], [0, 0, 1, 1], [], []>} : vector<16x24xf32>, vector<24x16xf32>, vector<16x16xf32> -> vector<16x16xf32>
    %c0_12 = arith.constant 0 : index
    %c0_13 = arith.constant 0 : index
    %18 = vector.load %arg5[%c0_12, %c0_13] : memref<16x128xf32, #tpu.memory_space<vmem>>, vector<16x128xf32>
    %cst_14 = arith.constant dense<0.000000e+00> : vector<16x128xf32>
    %19 = tpu.matmul %8, %18, %cst_14 {dimension_numbers = #tpu.dot_dimension_numbers<[1], [0], [0], [1], [0, 0, 1, 1], [], []>} : vector<16x16xf32>, vector<16x128xf32>, vector<16x128xf32> -> vector<16x128xf32>
    %c0_15 = arith.constant 0 : index
    %c0_16 = arith.constant 0 : index
    %20 = vector.load %arg7[%c0_15, %c0_16] : memref<1x128xf32, #tpu.memory_space<vmem>>, vector<1x128xf32>
    %21 = vector.broadcast %20 : vector<1x128xf32> to vector<16x128xf32>
    %22 = arith.addf %19, %21 : vector<16x128xf32>
    %c0_17 = arith.constant 0 : index
    %c0_18 = arith.constant 0 : index
    %23 = vector.load %arg8[%c0_17, %c0_18] : memref<16x128xf32, #tpu.memory_space<vmem>>, vector<16x128xf32>
    %cst_19 = arith.constant dense<0.000000e+00> : vector<16x128xf32>
    %24 = tpu.matmul %17, %23, %cst_19 {dimension_numbers = #tpu.dot_dimension_numbers<[1], [0], [0], [1], [0, 0, 1, 1], [], []>} : vector<16x16xf32>, vector<16x128xf32>, vector<16x128xf32> -> vector<16x128xf32>
    %c0_20 = arith.constant 0 : index
    %c0_21 = arith.constant 0 : index
    %25 = vector.load %arg10[%c0_20, %c0_21] : memref<1x128xf32, #tpu.memory_space<vmem>>, vector<1x128xf32>
    %26 = vector.broadcast %25 : vector<1x128xf32> to vector<16x128xf32>
    %27 = arith.addf %24, %26 : vector<16x128xf32>
    %cst_22 = arith.constant 0.000000e+00 : f32
    %28 = vector.broadcast %cst_22 : f32 to vector<2x32xf32>
    %cst_23 = arith.constant 0.000000e+00 : f32
    %29 = vector.broadcast %cst_23 : f32 to vector<2x32xf32>
    %c0_24 = arith.constant 0 : index
    %c0_25 = arith.constant 0 : index
    %30 = vector.load %arg6[%c0_24, %c0_25] : memref<32x128xf32, #tpu.memory_space<vmem>>, vector<32x128xf32>
    %31 = vector.extract_strided_slice %22 {offsets = [0, 0], sizes = [2, 128], strides = [1, 1]} : vector<16x128xf32> to vector<2x128xf32>
    %cst_26 = arith.constant dense<0.000000e+00> : vector<2x128xf32>
    %32 = tpu.matmul %28, %30, %cst_26 {dimension_numbers = #tpu.dot_dimension_numbers<[1], [0], [0], [1], [0, 0, 1, 1], [], []>} : vector<2x32xf32>, vector<32x128xf32>, vector<2x128xf32> -> vector<2x128xf32>
    %33 = arith.addf %31, %32 : vector<2x128xf32>
    %34 = vector.extract_strided_slice %33 {offsets = [0, 0], sizes = [2, 32], strides = [1, 1]} : vector<2x128xf32> to vector<2x32xf32>
    %35 = arith.negf %34 : vector<2x32xf32>
    %36 = math.exp %35 : vector<2x32xf32>
    %cst_27 = arith.constant 1.000000e+00 : f32
    %37 = vector.broadcast %cst_27 : f32 to vector<2x32xf32>
    %38 = arith.addf %37, %36 : vector<2x32xf32>
    %39 = arith.divf %37, %38 : vector<2x32xf32>
    %40 = vector.extract_strided_slice %33 {offsets = [0, 32], sizes = [2, 32], strides = [1, 1]} : vector<2x128xf32> to vector<2x32xf32>
    %41 = arith.negf %40 : vector<2x32xf32>
    %42 = math.exp %41 : vector<2x32xf32>
    %cst_28 = arith.constant 1.000000e+00 : f32
    %43 = vector.broadcast %cst_28 : f32 to vector<2x32xf32>
    %44 = arith.addf %43, %42 : vector<2x32xf32>
    %45 = arith.divf %43, %44 : vector<2x32xf32>
    %46 = vector.extract_strided_slice %33 {offsets = [0, 64], sizes = [2, 32], strides = [1, 1]} : vector<2x128xf32> to vector<2x32xf32>
    %47 = math.tanh %46 : vector<2x32xf32>
    %48 = vector.extract_strided_slice %33 {offsets = [0, 96], sizes = [2, 32], strides = [1, 1]} : vector<2x128xf32> to vector<2x32xf32>
    %49 = arith.negf %48 : vector<2x32xf32>
    %50 = math.exp %49 : vector<2x32xf32>
    %cst_29 = arith.constant 1.000000e+00 : f32
    %51 = vector.broadcast %cst_29 : f32 to vector<2x32xf32>
    %52 = arith.addf %51, %50 : vector<2x32xf32>
    %53 = arith.divf %51, %52 : vector<2x32xf32>
    %54 = arith.mulf %45, %29 : vector<2x32xf32>
    %55 = arith.mulf %39, %47 : vector<2x32xf32>
    %56 = arith.addf %54, %55 : vector<2x32xf32>
    %57 = math.tanh %56 : vector<2x32xf32>
    %58 = arith.mulf %53, %57 : vector<2x32xf32>
    %59 = vector.extract_strided_slice %22 {offsets = [2, 0], sizes = [2, 128], strides = [1, 1]} : vector<16x128xf32> to vector<2x128xf32>
    %cst_30 = arith.constant dense<0.000000e+00> : vector<2x128xf32>
    %60 = tpu.matmul %58, %30, %cst_30 {dimension_numbers = #tpu.dot_dimension_numbers<[1], [0], [0], [1], [0, 0, 1, 1], [], []>} : vector<2x32xf32>, vector<32x128xf32>, vector<2x128xf32> -> vector<2x128xf32>
    %61 = arith.addf %59, %60 : vector<2x128xf32>
    %62 = vector.extract_strided_slice %61 {offsets = [0, 0], sizes = [2, 32], strides = [1, 1]} : vector<2x128xf32> to vector<2x32xf32>
    %63 = arith.negf %62 : vector<2x32xf32>
    %64 = math.exp %63 : vector<2x32xf32>
    %cst_31 = arith.constant 1.000000e+00 : f32
    %65 = vector.broadcast %cst_31 : f32 to vector<2x32xf32>
    %66 = arith.addf %65, %64 : vector<2x32xf32>
    %67 = arith.divf %65, %66 : vector<2x32xf32>
    %68 = vector.extract_strided_slice %61 {offsets = [0, 32], sizes = [2, 32], strides = [1, 1]} : vector<2x128xf32> to vector<2x32xf32>
    %69 = arith.negf %68 : vector<2x32xf32>
    %70 = math.exp %69 : vector<2x32xf32>
    %cst_32 = arith.constant 1.000000e+00 : f32
    %71 = vector.broadcast %cst_32 : f32 to vector<2x32xf32>
    %72 = arith.addf %71, %70 : vector<2x32xf32>
    %73 = arith.divf %71, %72 : vector<2x32xf32>
    %74 = vector.extract_strided_slice %61 {offsets = [0, 64], sizes = [2, 32], strides = [1, 1]} : vector<2x128xf32> to vector<2x32xf32>
    %75 = math.tanh %74 : vector<2x32xf32>
    %76 = vector.extract_strided_slice %61 {offsets = [0, 96], sizes = [2, 32], strides = [1, 1]} : vector<2x128xf32> to vector<2x32xf32>
    %77 = arith.negf %76 : vector<2x32xf32>
    %78 = math.exp %77 : vector<2x32xf32>
    %cst_33 = arith.constant 1.000000e+00 : f32
    %79 = vector.broadcast %cst_33 : f32 to vector<2x32xf32>
    %80 = arith.addf %79, %78 : vector<2x32xf32>
    %81 = arith.divf %79, %80 : vector<2x32xf32>
    %82 = arith.mulf %73, %56 : vector<2x32xf32>
    %83 = arith.mulf %67, %75 : vector<2x32xf32>
    %84 = arith.addf %82, %83 : vector<2x32xf32>
    %85 = math.tanh %84 : vector<2x32xf32>
    %86 = arith.mulf %81, %85 : vector<2x32xf32>
    %87 = vector.extract_strided_slice %22 {offsets = [4, 0], sizes = [2, 128], strides = [1, 1]} : vector<16x128xf32> to vector<2x128xf32>
    %cst_34 = arith.constant dense<0.000000e+00> : vector<2x128xf32>
    %88 = tpu.matmul %86, %30, %cst_34 {dimension_numbers = #tpu.dot_dimension_numbers<[1], [0], [0], [1], [0, 0, 1, 1], [], []>} : vector<2x32xf32>, vector<32x128xf32>, vector<2x128xf32> -> vector<2x128xf32>
    %89 = arith.addf %87, %88 : vector<2x128xf32>
    %90 = vector.extract_strided_slice %89 {offsets = [0, 0], sizes = [2, 32], strides = [1, 1]} : vector<2x128xf32> to vector<2x32xf32>
    %91 = arith.negf %90 : vector<2x32xf32>
    %92 = math.exp %91 : vector<2x32xf32>
    %cst_35 = arith.constant 1.000000e+00 : f32
    %93 = vector.broadcast %cst_35 : f32 to vector<2x32xf32>
    %94 = arith.addf %93, %92 : vector<2x32xf32>
    %95 = arith.divf %93, %94 : vector<2x32xf32>
    %96 = vector.extract_strided_slice %89 {offsets = [0, 32], sizes = [2, 32], strides = [1, 1]} : vector<2x128xf32> to vector<2x32xf32>
    %97 = arith.negf %96 : vector<2x32xf32>
    %98 = math.exp %97 : vector<2x32xf32>
    %cst_36 = arith.constant 1.000000e+00 : f32
    %99 = vector.broadcast %cst_36 : f32 to vector<2x32xf32>
    %100 = arith.addf %99, %98 : vector<2x32xf32>
    %101 = arith.divf %99, %100 : vector<2x32xf32>
    %102 = vector.extract_strided_slice %89 {offsets = [0, 64], sizes = [2, 32], strides = [1, 1]} : vector<2x128xf32> to vector<2x32xf32>
    %103 = math.tanh %102 : vector<2x32xf32>
    %104 = vector.extract_strided_slice %89 {offsets = [0, 96], sizes = [2, 32], strides = [1, 1]} : vector<2x128xf32> to vector<2x32xf32>
    %105 = arith.negf %104 : vector<2x32xf32>
    %106 = math.exp %105 : vector<2x32xf32>
    %cst_37 = arith.constant 1.000000e+00 : f32
    %107 = vector.broadcast %cst_37 : f32 to vector<2x32xf32>
    %108 = arith.addf %107, %106 : vector<2x32xf32>
    %109 = arith.divf %107, %108 : vector<2x32xf32>
    %110 = arith.mulf %101, %84 : vector<2x32xf32>
    %111 = arith.mulf %95, %103 : vector<2x32xf32>
    %112 = arith.addf %110, %111 : vector<2x32xf32>
    %113 = math.tanh %112 : vector<2x32xf32>
    %114 = arith.mulf %109, %113 : vector<2x32xf32>
    %115 = vector.extract_strided_slice %22 {offsets = [6, 0], sizes = [2, 128], strides = [1, 1]} : vector<16x128xf32> to vector<2x128xf32>
    %cst_38 = arith.constant dense<0.000000e+00> : vector<2x128xf32>
    %116 = tpu.matmul %114, %30, %cst_38 {dimension_numbers = #tpu.dot_dimension_numbers<[1], [0], [0], [1], [0, 0, 1, 1], [], []>} : vector<2x32xf32>, vector<32x128xf32>, vector<2x128xf32> -> vector<2x128xf32>
    %117 = arith.addf %115, %116 : vector<2x128xf32>
    %118 = vector.extract_strided_slice %117 {offsets = [0, 0], sizes = [2, 32], strides = [1, 1]} : vector<2x128xf32> to vector<2x32xf32>
    %119 = arith.negf %118 : vector<2x32xf32>
    %120 = math.exp %119 : vector<2x32xf32>
    %cst_39 = arith.constant 1.000000e+00 : f32
    %121 = vector.broadcast %cst_39 : f32 to vector<2x32xf32>
    %122 = arith.addf %121, %120 : vector<2x32xf32>
    %123 = arith.divf %121, %122 : vector<2x32xf32>
    %124 = vector.extract_strided_slice %117 {offsets = [0, 32], sizes = [2, 32], strides = [1, 1]} : vector<2x128xf32> to vector<2x32xf32>
    %125 = arith.negf %124 : vector<2x32xf32>
    %126 = math.exp %125 : vector<2x32xf32>
    %cst_40 = arith.constant 1.000000e+00 : f32
    %127 = vector.broadcast %cst_40 : f32 to vector<2x32xf32>
    %128 = arith.addf %127, %126 : vector<2x32xf32>
    %129 = arith.divf %127, %128 : vector<2x32xf32>
    %130 = vector.extract_strided_slice %117 {offsets = [0, 64], sizes = [2, 32], strides = [1, 1]} : vector<2x128xf32> to vector<2x32xf32>
    %131 = math.tanh %130 : vector<2x32xf32>
    %132 = vector.extract_strided_slice %117 {offsets = [0, 96], sizes = [2, 32], strides = [1, 1]} : vector<2x128xf32> to vector<2x32xf32>
    %133 = arith.negf %132 : vector<2x32xf32>
    %134 = math.exp %133 : vector<2x32xf32>
    %cst_41 = arith.constant 1.000000e+00 : f32
    %135 = vector.broadcast %cst_41 : f32 to vector<2x32xf32>
    %136 = arith.addf %135, %134 : vector<2x32xf32>
    %137 = arith.divf %135, %136 : vector<2x32xf32>
    %138 = arith.mulf %129, %112 : vector<2x32xf32>
    %139 = arith.mulf %123, %131 : vector<2x32xf32>
    %140 = arith.addf %138, %139 : vector<2x32xf32>
    %141 = math.tanh %140 : vector<2x32xf32>
    %142 = arith.mulf %137, %141 : vector<2x32xf32>
    %143 = vector.extract_strided_slice %22 {offsets = [8, 0], sizes = [2, 128], strides = [1, 1]} : vector<16x128xf32> to vector<2x128xf32>
    %cst_42 = arith.constant dense<0.000000e+00> : vector<2x128xf32>
    %144 = tpu.matmul %142, %30, %cst_42 {dimension_numbers = #tpu.dot_dimension_numbers<[1], [0], [0], [1], [0, 0, 1, 1], [], []>} : vector<2x32xf32>, vector<32x128xf32>, vector<2x128xf32> -> vector<2x128xf32>
    %145 = arith.addf %143, %144 : vector<2x128xf32>
    %146 = vector.extract_strided_slice %145 {offsets = [0, 0], sizes = [2, 32], strides = [1, 1]} : vector<2x128xf32> to vector<2x32xf32>
    %147 = arith.negf %146 : vector<2x32xf32>
    %148 = math.exp %147 : vector<2x32xf32>
    %cst_43 = arith.constant 1.000000e+00 : f32
    %149 = vector.broadcast %cst_43 : f32 to vector<2x32xf32>
    %150 = arith.addf %149, %148 : vector<2x32xf32>
    %151 = arith.divf %149, %150 : vector<2x32xf32>
    %152 = vector.extract_strided_slice %145 {offsets = [0, 32], sizes = [2, 32], strides = [1, 1]} : vector<2x128xf32> to vector<2x32xf32>
    %153 = arith.negf %152 : vector<2x32xf32>
    %154 = math.exp %153 : vector<2x32xf32>
    %cst_44 = arith.constant 1.000000e+00 : f32
    %155 = vector.broadcast %cst_44 : f32 to vector<2x32xf32>
    %156 = arith.addf %155, %154 : vector<2x32xf32>
    %157 = arith.divf %155, %156 : vector<2x32xf32>
    %158 = vector.extract_strided_slice %145 {offsets = [0, 64], sizes = [2, 32], strides = [1, 1]} : vector<2x128xf32> to vector<2x32xf32>
    %159 = math.tanh %158 : vector<2x32xf32>
    %160 = vector.extract_strided_slice %145 {offsets = [0, 96], sizes = [2, 32], strides = [1, 1]} : vector<2x128xf32> to vector<2x32xf32>
    %161 = arith.negf %160 : vector<2x32xf32>
    %162 = math.exp %161 : vector<2x32xf32>
    %cst_45 = arith.constant 1.000000e+00 : f32
    %163 = vector.broadcast %cst_45 : f32 to vector<2x32xf32>
    %164 = arith.addf %163, %162 : vector<2x32xf32>
    %165 = arith.divf %163, %164 : vector<2x32xf32>
    %166 = arith.mulf %157, %140 : vector<2x32xf32>
    %167 = arith.mulf %151, %159 : vector<2x32xf32>
    %168 = arith.addf %166, %167 : vector<2x32xf32>
    %169 = math.tanh %168 : vector<2x32xf32>
    %170 = arith.mulf %165, %169 : vector<2x32xf32>
    %171 = vector.extract_strided_slice %22 {offsets = [10, 0], sizes = [2, 128], strides = [1, 1]} : vector<16x128xf32> to vector<2x128xf32>
    %cst_46 = arith.constant dense<0.000000e+00> : vector<2x128xf32>
    %172 = tpu.matmul %170, %30, %cst_46 {dimension_numbers = #tpu.dot_dimension_numbers<[1], [0], [0], [1], [0, 0, 1, 1], [], []>} : vector<2x32xf32>, vector<32x128xf32>, vector<2x128xf32> -> vector<2x128xf32>
    %173 = arith.addf %171, %172 : vector<2x128xf32>
    %174 = vector.extract_strided_slice %173 {offsets = [0, 0], sizes = [2, 32], strides = [1, 1]} : vector<2x128xf32> to vector<2x32xf32>
    %175 = arith.negf %174 : vector<2x32xf32>
    %176 = math.exp %175 : vector<2x32xf32>
    %cst_47 = arith.constant 1.000000e+00 : f32
    %177 = vector.broadcast %cst_47 : f32 to vector<2x32xf32>
    %178 = arith.addf %177, %176 : vector<2x32xf32>
    %179 = arith.divf %177, %178 : vector<2x32xf32>
    %180 = vector.extract_strided_slice %173 {offsets = [0, 32], sizes = [2, 32], strides = [1, 1]} : vector<2x128xf32> to vector<2x32xf32>
    %181 = arith.negf %180 : vector<2x32xf32>
    %182 = math.exp %181 : vector<2x32xf32>
    %cst_48 = arith.constant 1.000000e+00 : f32
    %183 = vector.broadcast %cst_48 : f32 to vector<2x32xf32>
    %184 = arith.addf %183, %182 : vector<2x32xf32>
    %185 = arith.divf %183, %184 : vector<2x32xf32>
    %186 = vector.extract_strided_slice %173 {offsets = [0, 64], sizes = [2, 32], strides = [1, 1]} : vector<2x128xf32> to vector<2x32xf32>
    %187 = math.tanh %186 : vector<2x32xf32>
    %188 = vector.extract_strided_slice %173 {offsets = [0, 96], sizes = [2, 32], strides = [1, 1]} : vector<2x128xf32> to vector<2x32xf32>
    %189 = arith.negf %188 : vector<2x32xf32>
    %190 = math.exp %189 : vector<2x32xf32>
    %cst_49 = arith.constant 1.000000e+00 : f32
    %191 = vector.broadcast %cst_49 : f32 to vector<2x32xf32>
    %192 = arith.addf %191, %190 : vector<2x32xf32>
    %193 = arith.divf %191, %192 : vector<2x32xf32>
    %194 = arith.mulf %185, %168 : vector<2x32xf32>
    %195 = arith.mulf %179, %187 : vector<2x32xf32>
    %196 = arith.addf %194, %195 : vector<2x32xf32>
    %197 = math.tanh %196 : vector<2x32xf32>
    %198 = arith.mulf %193, %197 : vector<2x32xf32>
    %199 = vector.extract_strided_slice %22 {offsets = [12, 0], sizes = [2, 128], strides = [1, 1]} : vector<16x128xf32> to vector<2x128xf32>
    %cst_50 = arith.constant dense<0.000000e+00> : vector<2x128xf32>
    %200 = tpu.matmul %198, %30, %cst_50 {dimension_numbers = #tpu.dot_dimension_numbers<[1], [0], [0], [1], [0, 0, 1, 1], [], []>} : vector<2x32xf32>, vector<32x128xf32>, vector<2x128xf32> -> vector<2x128xf32>
    %201 = arith.addf %199, %200 : vector<2x128xf32>
    %202 = vector.extract_strided_slice %201 {offsets = [0, 0], sizes = [2, 32], strides = [1, 1]} : vector<2x128xf32> to vector<2x32xf32>
    %203 = arith.negf %202 : vector<2x32xf32>
    %204 = math.exp %203 : vector<2x32xf32>
    %cst_51 = arith.constant 1.000000e+00 : f32
    %205 = vector.broadcast %cst_51 : f32 to vector<2x32xf32>
    %206 = arith.addf %205, %204 : vector<2x32xf32>
    %207 = arith.divf %205, %206 : vector<2x32xf32>
    %208 = vector.extract_strided_slice %201 {offsets = [0, 32], sizes = [2, 32], strides = [1, 1]} : vector<2x128xf32> to vector<2x32xf32>
    %209 = arith.negf %208 : vector<2x32xf32>
    %210 = math.exp %209 : vector<2x32xf32>
    %cst_52 = arith.constant 1.000000e+00 : f32
    %211 = vector.broadcast %cst_52 : f32 to vector<2x32xf32>
    %212 = arith.addf %211, %210 : vector<2x32xf32>
    %213 = arith.divf %211, %212 : vector<2x32xf32>
    %214 = vector.extract_strided_slice %201 {offsets = [0, 64], sizes = [2, 32], strides = [1, 1]} : vector<2x128xf32> to vector<2x32xf32>
    %215 = math.tanh %214 : vector<2x32xf32>
    %216 = vector.extract_strided_slice %201 {offsets = [0, 96], sizes = [2, 32], strides = [1, 1]} : vector<2x128xf32> to vector<2x32xf32>
    %217 = arith.negf %216 : vector<2x32xf32>
    %218 = math.exp %217 : vector<2x32xf32>
    %cst_53 = arith.constant 1.000000e+00 : f32
    %219 = vector.broadcast %cst_53 : f32 to vector<2x32xf32>
    %220 = arith.addf %219, %218 : vector<2x32xf32>
    %221 = arith.divf %219, %220 : vector<2x32xf32>
    %222 = arith.mulf %213, %196 : vector<2x32xf32>
    %223 = arith.mulf %207, %215 : vector<2x32xf32>
    %224 = arith.addf %222, %223 : vector<2x32xf32>
    %225 = math.tanh %224 : vector<2x32xf32>
    %226 = arith.mulf %221, %225 : vector<2x32xf32>
    %227 = vector.extract_strided_slice %22 {offsets = [14, 0], sizes = [2, 128], strides = [1, 1]} : vector<16x128xf32> to vector<2x128xf32>
    %cst_54 = arith.constant dense<0.000000e+00> : vector<2x128xf32>
    %228 = tpu.matmul %226, %30, %cst_54 {dimension_numbers = #tpu.dot_dimension_numbers<[1], [0], [0], [1], [0, 0, 1, 1], [], []>} : vector<2x32xf32>, vector<32x128xf32>, vector<2x128xf32> -> vector<2x128xf32>
    %229 = arith.addf %227, %228 : vector<2x128xf32>
    %230 = vector.extract_strided_slice %229 {offsets = [0, 0], sizes = [2, 32], strides = [1, 1]} : vector<2x128xf32> to vector<2x32xf32>
    %231 = arith.negf %230 : vector<2x32xf32>
    %232 = math.exp %231 : vector<2x32xf32>
    %cst_55 = arith.constant 1.000000e+00 : f32
    %233 = vector.broadcast %cst_55 : f32 to vector<2x32xf32>
    %234 = arith.addf %233, %232 : vector<2x32xf32>
    %235 = arith.divf %233, %234 : vector<2x32xf32>
    %236 = vector.extract_strided_slice %229 {offsets = [0, 32], sizes = [2, 32], strides = [1, 1]} : vector<2x128xf32> to vector<2x32xf32>
    %237 = arith.negf %236 : vector<2x32xf32>
    %238 = math.exp %237 : vector<2x32xf32>
    %cst_56 = arith.constant 1.000000e+00 : f32
    %239 = vector.broadcast %cst_56 : f32 to vector<2x32xf32>
    %240 = arith.addf %239, %238 : vector<2x32xf32>
    %241 = arith.divf %239, %240 : vector<2x32xf32>
    %242 = vector.extract_strided_slice %229 {offsets = [0, 64], sizes = [2, 32], strides = [1, 1]} : vector<2x128xf32> to vector<2x32xf32>
    %243 = math.tanh %242 : vector<2x32xf32>
    %244 = vector.extract_strided_slice %229 {offsets = [0, 96], sizes = [2, 32], strides = [1, 1]} : vector<2x128xf32> to vector<2x32xf32>
    %245 = arith.negf %244 : vector<2x32xf32>
    %246 = math.exp %245 : vector<2x32xf32>
    %cst_57 = arith.constant 1.000000e+00 : f32
    %247 = vector.broadcast %cst_57 : f32 to vector<2x32xf32>
    %248 = arith.addf %247, %246 : vector<2x32xf32>
    %249 = arith.divf %247, %248 : vector<2x32xf32>
    %250 = arith.mulf %241, %224 : vector<2x32xf32>
    %251 = arith.mulf %235, %243 : vector<2x32xf32>
    %252 = arith.addf %250, %251 : vector<2x32xf32>
    %253 = math.tanh %252 : vector<2x32xf32>
    %254 = arith.mulf %249, %253 : vector<2x32xf32>
    %c0_58 = arith.constant 0 : index
    %c0_59 = arith.constant 0 : index
    %255 = vector.load %arg9[%c0_58, %c0_59] : memref<32x128xf32, #tpu.memory_space<vmem>>, vector<32x128xf32>
    %256 = vector.extract_strided_slice %27 {offsets = [0, 0], sizes = [2, 128], strides = [1, 1]} : vector<16x128xf32> to vector<2x128xf32>
    %cst_60 = arith.constant dense<0.000000e+00> : vector<2x128xf32>
    %257 = tpu.matmul %254, %255, %cst_60 {dimension_numbers = #tpu.dot_dimension_numbers<[1], [0], [0], [1], [0, 0, 1, 1], [], []>} : vector<2x32xf32>, vector<32x128xf32>, vector<2x128xf32> -> vector<2x128xf32>
    %258 = arith.addf %256, %257 : vector<2x128xf32>
    %259 = vector.extract_strided_slice %258 {offsets = [0, 0], sizes = [2, 32], strides = [1, 1]} : vector<2x128xf32> to vector<2x32xf32>
    %260 = arith.negf %259 : vector<2x32xf32>
    %261 = math.exp %260 : vector<2x32xf32>
    %cst_61 = arith.constant 1.000000e+00 : f32
    %262 = vector.broadcast %cst_61 : f32 to vector<2x32xf32>
    %263 = arith.addf %262, %261 : vector<2x32xf32>
    %264 = arith.divf %262, %263 : vector<2x32xf32>
    %265 = vector.extract_strided_slice %258 {offsets = [0, 32], sizes = [2, 32], strides = [1, 1]} : vector<2x128xf32> to vector<2x32xf32>
    %266 = arith.negf %265 : vector<2x32xf32>
    %267 = math.exp %266 : vector<2x32xf32>
    %cst_62 = arith.constant 1.000000e+00 : f32
    %268 = vector.broadcast %cst_62 : f32 to vector<2x32xf32>
    %269 = arith.addf %268, %267 : vector<2x32xf32>
    %270 = arith.divf %268, %269 : vector<2x32xf32>
    %271 = vector.extract_strided_slice %258 {offsets = [0, 64], sizes = [2, 32], strides = [1, 1]} : vector<2x128xf32> to vector<2x32xf32>
    %272 = math.tanh %271 : vector<2x32xf32>
    %273 = vector.extract_strided_slice %258 {offsets = [0, 96], sizes = [2, 32], strides = [1, 1]} : vector<2x128xf32> to vector<2x32xf32>
    %274 = arith.negf %273 : vector<2x32xf32>
    %275 = math.exp %274 : vector<2x32xf32>
    %cst_63 = arith.constant 1.000000e+00 : f32
    %276 = vector.broadcast %cst_63 : f32 to vector<2x32xf32>
    %277 = arith.addf %276, %275 : vector<2x32xf32>
    %278 = arith.divf %276, %277 : vector<2x32xf32>
    %279 = arith.mulf %270, %252 : vector<2x32xf32>
    %280 = arith.mulf %264, %272 : vector<2x32xf32>
    %281 = arith.addf %279, %280 : vector<2x32xf32>
    %282 = math.tanh %281 : vector<2x32xf32>
    %283 = arith.mulf %278, %282 : vector<2x32xf32>
    %c0_64 = arith.constant 0 : index
    %c0_65 = arith.constant 0 : index
    %284 = vector.load %arg14[%c0_64, %c0_65] : memref<16x32xf32, #tpu.memory_space<vmem>>, vector<2x32xf32>
    tpu.vector_store %arg14[%c0_64, %c0_65], %283 {strides = array<i32>} : memref<16x32xf32, #tpu.memory_space<vmem>>, vector<2x32xf32>,
    %285 = vector.extract_strided_slice %27 {offsets = [2, 0], sizes = [2, 128], strides = [1, 1]} : vector<16x128xf32> to vector<2x128xf32>
    %cst_66 = arith.constant dense<0.000000e+00> : vector<2x128xf32>
    %286 = tpu.matmul %283, %255, %cst_66 {dimension_numbers = #tpu.dot_dimension_numbers<[1], [0], [0], [1], [0, 0, 1, 1], [], []>} : vector<2x32xf32>, vector<32x128xf32>, vector<2x128xf32> -> vector<2x128xf32>
    %287 = arith.addf %285, %286 : vector<2x128xf32>
    %288 = vector.extract_strided_slice %287 {offsets = [0, 0], sizes = [2, 32], strides = [1, 1]} : vector<2x128xf32> to vector<2x32xf32>
    %289 = arith.negf %288 : vector<2x32xf32>
    %290 = math.exp %289 : vector<2x32xf32>
    %cst_67 = arith.constant 1.000000e+00 : f32
    %291 = vector.broadcast %cst_67 : f32 to vector<2x32xf32>
    %292 = arith.addf %291, %290 : vector<2x32xf32>
    %293 = arith.divf %291, %292 : vector<2x32xf32>
    %294 = vector.extract_strided_slice %287 {offsets = [0, 32], sizes = [2, 32], strides = [1, 1]} : vector<2x128xf32> to vector<2x32xf32>
    %295 = arith.negf %294 : vector<2x32xf32>
    %296 = math.exp %295 : vector<2x32xf32>
    %cst_68 = arith.constant 1.000000e+00 : f32
    %297 = vector.broadcast %cst_68 : f32 to vector<2x32xf32>
    %298 = arith.addf %297, %296 : vector<2x32xf32>
    %299 = arith.divf %297, %298 : vector<2x32xf32>
    %300 = vector.extract_strided_slice %287 {offsets = [0, 64], sizes = [2, 32], strides = [1, 1]} : vector<2x128xf32> to vector<2x32xf32>
    %301 = math.tanh %300 : vector<2x32xf32>
    %302 = vector.extract_strided_slice %287 {offsets = [0, 96], sizes = [2, 32], strides = [1, 1]} : vector<2x128xf32> to vector<2x32xf32>
    %303 = arith.negf %302 : vector<2x32xf32>
    %304 = math.exp %303 : vector<2x32xf32>
    %cst_69 = arith.constant 1.000000e+00 : f32
    %305 = vector.broadcast %cst_69 : f32 to vector<2x32xf32>
    %306 = arith.addf %305, %304 : vector<2x32xf32>
    %307 = arith.divf %305, %306 : vector<2x32xf32>
    %308 = arith.mulf %299, %281 : vector<2x32xf32>
    %309 = arith.mulf %293, %301 : vector<2x32xf32>
    %310 = arith.addf %308, %309 : vector<2x32xf32>
    %311 = math.tanh %310 : vector<2x32xf32>
    %312 = arith.mulf %307, %311 : vector<2x32xf32>
    %c2 = arith.constant 2 : index
    %c0_70 = arith.constant 0 : index
    %313 = vector.load %arg14[%c2, %c0_70] : memref<16x32xf32, #tpu.memory_space<vmem>>, vector<2x32xf32>
    tpu.vector_store %arg14[%c2, %c0_70], %312 {strides = array<i32>} : memref<16x32xf32, #tpu.memory_space<vmem>>, vector<2x32xf32>,
    %314 = vector.extract_strided_slice %27 {offsets = [4, 0], sizes = [2, 128], strides = [1, 1]} : vector<16x128xf32> to vector<2x128xf32>
    %cst_71 = arith.constant dense<0.000000e+00> : vector<2x128xf32>
    %315 = tpu.matmul %312, %255, %cst_71 {dimension_numbers = #tpu.dot_dimension_numbers<[1], [0], [0], [1], [0, 0, 1, 1], [], []>} : vector<2x32xf32>, vector<32x128xf32>, vector<2x128xf32> -> vector<2x128xf32>
    %316 = arith.addf %314, %315 : vector<2x128xf32>
    %317 = vector.extract_strided_slice %316 {offsets = [0, 0], sizes = [2, 32], strides = [1, 1]} : vector<2x128xf32> to vector<2x32xf32>
    %318 = arith.negf %317 : vector<2x32xf32>
    %319 = math.exp %318 : vector<2x32xf32>
    %cst_72 = arith.constant 1.000000e+00 : f32
    %320 = vector.broadcast %cst_72 : f32 to vector<2x32xf32>
    %321 = arith.addf %320, %319 : vector<2x32xf32>
    %322 = arith.divf %320, %321 : vector<2x32xf32>
    %323 = vector.extract_strided_slice %316 {offsets = [0, 32], sizes = [2, 32], strides = [1, 1]} : vector<2x128xf32> to vector<2x32xf32>
    %324 = arith.negf %323 : vector<2x32xf32>
    %325 = math.exp %324 : vector<2x32xf32>
    %cst_73 = arith.constant 1.000000e+00 : f32
    %326 = vector.broadcast %cst_73 : f32 to vector<2x32xf32>
    %327 = arith.addf %326, %325 : vector<2x32xf32>
    %328 = arith.divf %326, %327 : vector<2x32xf32>
    %329 = vector.extract_strided_slice %316 {offsets = [0, 64], sizes = [2, 32], strides = [1, 1]} : vector<2x128xf32> to vector<2x32xf32>
    %330 = math.tanh %329 : vector<2x32xf32>
    %331 = vector.extract_strided_slice %316 {offsets = [0, 96], sizes = [2, 32], strides = [1, 1]} : vector<2x128xf32> to vector<2x32xf32>
    %332 = arith.negf %331 : vector<2x32xf32>
    %333 = math.exp %332 : vector<2x32xf32>
    %cst_74 = arith.constant 1.000000e+00 : f32
    %334 = vector.broadcast %cst_74 : f32 to vector<2x32xf32>
    %335 = arith.addf %334, %333 : vector<2x32xf32>
    %336 = arith.divf %334, %335 : vector<2x32xf32>
    %337 = arith.mulf %328, %310 : vector<2x32xf32>
    %338 = arith.mulf %322, %330 : vector<2x32xf32>
    %339 = arith.addf %337, %338 : vector<2x32xf32>
    %340 = math.tanh %339 : vector<2x32xf32>
    %341 = arith.mulf %336, %340 : vector<2x32xf32>
    %c4 = arith.constant 4 : index
    %c0_75 = arith.constant 0 : index
    %342 = vector.load %arg14[%c4, %c0_75] : memref<16x32xf32, #tpu.memory_space<vmem>>, vector<2x32xf32>
    tpu.vector_store %arg14[%c4, %c0_75], %341 {strides = array<i32>} : memref<16x32xf32, #tpu.memory_space<vmem>>, vector<2x32xf32>,
    %343 = vector.extract_strided_slice %27 {offsets = [6, 0], sizes = [2, 128], strides = [1, 1]} : vector<16x128xf32> to vector<2x128xf32>
    %cst_76 = arith.constant dense<0.000000e+00> : vector<2x128xf32>
    %344 = tpu.matmul %341, %255, %cst_76 {dimension_numbers = #tpu.dot_dimension_numbers<[1], [0], [0], [1], [0, 0, 1, 1], [], []>} : vector<2x32xf32>, vector<32x128xf32>, vector<2x128xf32> -> vector<2x128xf32>
    %345 = arith.addf %343, %344 : vector<2x128xf32>
    %346 = vector.extract_strided_slice %345 {offsets = [0, 0], sizes = [2, 32], strides = [1, 1]} : vector<2x128xf32> to vector<2x32xf32>
    %347 = arith.negf %346 : vector<2x32xf32>
    %348 = math.exp %347 : vector<2x32xf32>
    %cst_77 = arith.constant 1.000000e+00 : f32
    %349 = vector.broadcast %cst_77 : f32 to vector<2x32xf32>
    %350 = arith.addf %349, %348 : vector<2x32xf32>
    %351 = arith.divf %349, %350 : vector<2x32xf32>
    %352 = vector.extract_strided_slice %345 {offsets = [0, 32], sizes = [2, 32], strides = [1, 1]} : vector<2x128xf32> to vector<2x32xf32>
    %353 = arith.negf %352 : vector<2x32xf32>
    %354 = math.exp %353 : vector<2x32xf32>
    %cst_78 = arith.constant 1.000000e+00 : f32
    %355 = vector.broadcast %cst_78 : f32 to vector<2x32xf32>
    %356 = arith.addf %355, %354 : vector<2x32xf32>
    %357 = arith.divf %355, %356 : vector<2x32xf32>
    %358 = vector.extract_strided_slice %345 {offsets = [0, 64], sizes = [2, 32], strides = [1, 1]} : vector<2x128xf32> to vector<2x32xf32>
    %359 = math.tanh %358 : vector<2x32xf32>
    %360 = vector.extract_strided_slice %345 {offsets = [0, 96], sizes = [2, 32], strides = [1, 1]} : vector<2x128xf32> to vector<2x32xf32>
    %361 = arith.negf %360 : vector<2x32xf32>
    %362 = math.exp %361 : vector<2x32xf32>
    %cst_79 = arith.constant 1.000000e+00 : f32
    %363 = vector.broadcast %cst_79 : f32 to vector<2x32xf32>
    %364 = arith.addf %363, %362 : vector<2x32xf32>
    %365 = arith.divf %363, %364 : vector<2x32xf32>
    %366 = arith.mulf %357, %339 : vector<2x32xf32>
    %367 = arith.mulf %351, %359 : vector<2x32xf32>
    %368 = arith.addf %366, %367 : vector<2x32xf32>
    %369 = math.tanh %368 : vector<2x32xf32>
    %370 = arith.mulf %365, %369 : vector<2x32xf32>
    %c6 = arith.constant 6 : index
    %c0_80 = arith.constant 0 : index
    %371 = vector.load %arg14[%c6, %c0_80] : memref<16x32xf32, #tpu.memory_space<vmem>>, vector<2x32xf32>
    tpu.vector_store %arg14[%c6, %c0_80], %370 {strides = array<i32>} : memref<16x32xf32, #tpu.memory_space<vmem>>, vector<2x32xf32>,
    %372 = vector.extract_strided_slice %27 {offsets = [8, 0], sizes = [2, 128], strides = [1, 1]} : vector<16x128xf32> to vector<2x128xf32>
    %cst_81 = arith.constant dense<0.000000e+00> : vector<2x128xf32>
    %373 = tpu.matmul %370, %255, %cst_81 {dimension_numbers = #tpu.dot_dimension_numbers<[1], [0], [0], [1], [0, 0, 1, 1], [], []>} : vector<2x32xf32>, vector<32x128xf32>, vector<2x128xf32> -> vector<2x128xf32>
    %374 = arith.addf %372, %373 : vector<2x128xf32>
    %375 = vector.extract_strided_slice %374 {offsets = [0, 0], sizes = [2, 32], strides = [1, 1]} : vector<2x128xf32> to vector<2x32xf32>
    %376 = arith.negf %375 : vector<2x32xf32>
    %377 = math.exp %376 : vector<2x32xf32>
    %cst_82 = arith.constant 1.000000e+00 : f32
    %378 = vector.broadcast %cst_82 : f32 to vector<2x32xf32>
    %379 = arith.addf %378, %377 : vector<2x32xf32>
    %380 = arith.divf %378, %379 : vector<2x32xf32>
    %381 = vector.extract_strided_slice %374 {offsets = [0, 32], sizes = [2, 32], strides = [1, 1]} : vector<2x128xf32> to vector<2x32xf32>
    %382 = arith.negf %381 : vector<2x32xf32>
    %383 = math.exp %382 : vector<2x32xf32>
    %cst_83 = arith.constant 1.000000e+00 : f32
    %384 = vector.broadcast %cst_83 : f32 to vector<2x32xf32>
    %385 = arith.addf %384, %383 : vector<2x32xf32>
    %386 = arith.divf %384, %385 : vector<2x32xf32>
    %387 = vector.extract_strided_slice %374 {offsets = [0, 64], sizes = [2, 32], strides = [1, 1]} : vector<2x128xf32> to vector<2x32xf32>
    %388 = math.tanh %387 : vector<2x32xf32>
    %389 = vector.extract_strided_slice %374 {offsets = [0, 96], sizes = [2, 32], strides = [1, 1]} : vector<2x128xf32> to vector<2x32xf32>
    %390 = arith.negf %389 : vector<2x32xf32>
    %391 = math.exp %390 : vector<2x32xf32>
    %cst_84 = arith.constant 1.000000e+00 : f32
    %392 = vector.broadcast %cst_84 : f32 to vector<2x32xf32>
    %393 = arith.addf %392, %391 : vector<2x32xf32>
    %394 = arith.divf %392, %393 : vector<2x32xf32>
    %395 = arith.mulf %386, %368 : vector<2x32xf32>
    %396 = arith.mulf %380, %388 : vector<2x32xf32>
    %397 = arith.addf %395, %396 : vector<2x32xf32>
    %398 = math.tanh %397 : vector<2x32xf32>
    %399 = arith.mulf %394, %398 : vector<2x32xf32>
    %c8 = arith.constant 8 : index
    %c0_85 = arith.constant 0 : index
    %400 = vector.load %arg14[%c8, %c0_85] : memref<16x32xf32, #tpu.memory_space<vmem>>, vector<2x32xf32>
    tpu.vector_store %arg14[%c8, %c0_85], %399 {strides = array<i32>} : memref<16x32xf32, #tpu.memory_space<vmem>>, vector<2x32xf32>,
    %401 = vector.extract_strided_slice %27 {offsets = [10, 0], sizes = [2, 128], strides = [1, 1]} : vector<16x128xf32> to vector<2x128xf32>
    %cst_86 = arith.constant dense<0.000000e+00> : vector<2x128xf32>
    %402 = tpu.matmul %399, %255, %cst_86 {dimension_numbers = #tpu.dot_dimension_numbers<[1], [0], [0], [1], [0, 0, 1, 1], [], []>} : vector<2x32xf32>, vector<32x128xf32>, vector<2x128xf32> -> vector<2x128xf32>
    %403 = arith.addf %401, %402 : vector<2x128xf32>
    %404 = vector.extract_strided_slice %403 {offsets = [0, 0], sizes = [2, 32], strides = [1, 1]} : vector<2x128xf32> to vector<2x32xf32>
    %405 = arith.negf %404 : vector<2x32xf32>
    %406 = math.exp %405 : vector<2x32xf32>
    %cst_87 = arith.constant 1.000000e+00 : f32
    %407 = vector.broadcast %cst_87 : f32 to vector<2x32xf32>
    %408 = arith.addf %407, %406 : vector<2x32xf32>
    %409 = arith.divf %407, %408 : vector<2x32xf32>
    %410 = vector.extract_strided_slice %403 {offsets = [0, 32], sizes = [2, 32], strides = [1, 1]} : vector<2x128xf32> to vector<2x32xf32>
    %411 = arith.negf %410 : vector<2x32xf32>
    %412 = math.exp %411 : vector<2x32xf32>
    %cst_88 = arith.constant 1.000000e+00 : f32
    %413 = vector.broadcast %cst_88 : f32 to vector<2x32xf32>
    %414 = arith.addf %413, %412 : vector<2x32xf32>
    %415 = arith.divf %413, %414 : vector<2x32xf32>
    %416 = vector.extract_strided_slice %403 {offsets = [0, 64], sizes = [2, 32], strides = [1, 1]} : vector<2x128xf32> to vector<2x32xf32>
    %417 = math.tanh %416 : vector<2x32xf32>
    %418 = vector.extract_strided_slice %403 {offsets = [0, 96], sizes = [2, 32], strides = [1, 1]} : vector<2x128xf32> to vector<2x32xf32>
    %419 = arith.negf %418 : vector<2x32xf32>
    %420 = math.exp %419 : vector<2x32xf32>
    %cst_89 = arith.constant 1.000000e+00 : f32
    %421 = vector.broadcast %cst_89 : f32 to vector<2x32xf32>
    %422 = arith.addf %421, %420 : vector<2x32xf32>
    %423 = arith.divf %421, %422 : vector<2x32xf32>
    %424 = arith.mulf %415, %397 : vector<2x32xf32>
    %425 = arith.mulf %409, %417 : vector<2x32xf32>
    %426 = arith.addf %424, %425 : vector<2x32xf32>
    %427 = math.tanh %426 : vector<2x32xf32>
    %428 = arith.mulf %423, %427 : vector<2x32xf32>
    %c10 = arith.constant 10 : index
    %c0_90 = arith.constant 0 : index
    %429 = vector.load %arg14[%c10, %c0_90] : memref<16x32xf32, #tpu.memory_space<vmem>>, vector<2x32xf32>
    tpu.vector_store %arg14[%c10, %c0_90], %428 {strides = array<i32>} : memref<16x32xf32, #tpu.memory_space<vmem>>, vector<2x32xf32>,
    %430 = vector.extract_strided_slice %27 {offsets = [12, 0], sizes = [2, 128], strides = [1, 1]} : vector<16x128xf32> to vector<2x128xf32>
    %cst_91 = arith.constant dense<0.000000e+00> : vector<2x128xf32>
    %431 = tpu.matmul %428, %255, %cst_91 {dimension_numbers = #tpu.dot_dimension_numbers<[1], [0], [0], [1], [0, 0, 1, 1], [], []>} : vector<2x32xf32>, vector<32x128xf32>, vector<2x128xf32> -> vector<2x128xf32>
    %432 = arith.addf %430, %431 : vector<2x128xf32>
    %433 = vector.extract_strided_slice %432 {offsets = [0, 0], sizes = [2, 32], strides = [1, 1]} : vector<2x128xf32> to vector<2x32xf32>
    %434 = arith.negf %433 : vector<2x32xf32>
    %435 = math.exp %434 : vector<2x32xf32>
    %cst_92 = arith.constant 1.000000e+00 : f32
    %436 = vector.broadcast %cst_92 : f32 to vector<2x32xf32>
    %437 = arith.addf %436, %435 : vector<2x32xf32>
    %438 = arith.divf %436, %437 : vector<2x32xf32>
    %439 = vector.extract_strided_slice %432 {offsets = [0, 32], sizes = [2, 32], strides = [1, 1]} : vector<2x128xf32> to vector<2x32xf32>
    %440 = arith.negf %439 : vector<2x32xf32>
    %441 = math.exp %440 : vector<2x32xf32>
    %cst_93 = arith.constant 1.000000e+00 : f32
    %442 = vector.broadcast %cst_93 : f32 to vector<2x32xf32>
    %443 = arith.addf %442, %441 : vector<2x32xf32>
    %444 = arith.divf %442, %443 : vector<2x32xf32>
    %445 = vector.extract_strided_slice %432 {offsets = [0, 64], sizes = [2, 32], strides = [1, 1]} : vector<2x128xf32> to vector<2x32xf32>
    %446 = math.tanh %445 : vector<2x32xf32>
    %447 = vector.extract_strided_slice %432 {offsets = [0, 96], sizes = [2, 32], strides = [1, 1]} : vector<2x128xf32> to vector<2x32xf32>
    %448 = arith.negf %447 : vector<2x32xf32>
    %449 = math.exp %448 : vector<2x32xf32>
    %cst_94 = arith.constant 1.000000e+00 : f32
    %450 = vector.broadcast %cst_94 : f32 to vector<2x32xf32>
    %451 = arith.addf %450, %449 : vector<2x32xf32>
    %452 = arith.divf %450, %451 : vector<2x32xf32>
    %453 = arith.mulf %444, %426 : vector<2x32xf32>
    %454 = arith.mulf %438, %446 : vector<2x32xf32>
    %455 = arith.addf %453, %454 : vector<2x32xf32>
    %456 = math.tanh %455 : vector<2x32xf32>
    %457 = arith.mulf %452, %456 : vector<2x32xf32>
    %c12 = arith.constant 12 : index
    %c0_95 = arith.constant 0 : index
    %458 = vector.load %arg14[%c12, %c0_95] : memref<16x32xf32, #tpu.memory_space<vmem>>, vector<2x32xf32>
    tpu.vector_store %arg14[%c12, %c0_95], %457 {strides = array<i32>} : memref<16x32xf32, #tpu.memory_space<vmem>>, vector<2x32xf32>,
    %459 = vector.extract_strided_slice %27 {offsets = [14, 0], sizes = [2, 128], strides = [1, 1]} : vector<16x128xf32> to vector<2x128xf32>
    %cst_96 = arith.constant dense<0.000000e+00> : vector<2x128xf32>
    %460 = tpu.matmul %457, %255, %cst_96 {dimension_numbers = #tpu.dot_dimension_numbers<[1], [0], [0], [1], [0, 0, 1, 1], [], []>} : vector<2x32xf32>, vector<32x128xf32>, vector<2x128xf32> -> vector<2x128xf32>
    %461 = arith.addf %459, %460 : vector<2x128xf32>
    %462 = vector.extract_strided_slice %461 {offsets = [0, 0], sizes = [2, 32], strides = [1, 1]} : vector<2x128xf32> to vector<2x32xf32>
    %463 = arith.negf %462 : vector<2x32xf32>
    %464 = math.exp %463 : vector<2x32xf32>
    %cst_97 = arith.constant 1.000000e+00 : f32
    %465 = vector.broadcast %cst_97 : f32 to vector<2x32xf32>
    %466 = arith.addf %465, %464 : vector<2x32xf32>
    %467 = arith.divf %465, %466 : vector<2x32xf32>
    %468 = vector.extract_strided_slice %461 {offsets = [0, 32], sizes = [2, 32], strides = [1, 1]} : vector<2x128xf32> to vector<2x32xf32>
    %469 = arith.negf %468 : vector<2x32xf32>
    %470 = math.exp %469 : vector<2x32xf32>
    %cst_98 = arith.constant 1.000000e+00 : f32
    %471 = vector.broadcast %cst_98 : f32 to vector<2x32xf32>
    %472 = arith.addf %471, %470 : vector<2x32xf32>
    %473 = arith.divf %471, %472 : vector<2x32xf32>
    %474 = vector.extract_strided_slice %461 {offsets = [0, 64], sizes = [2, 32], strides = [1, 1]} : vector<2x128xf32> to vector<2x32xf32>
    %475 = math.tanh %474 : vector<2x32xf32>
    %476 = vector.extract_strided_slice %461 {offsets = [0, 96], sizes = [2, 32], strides = [1, 1]} : vector<2x128xf32> to vector<2x32xf32>
    %477 = arith.negf %476 : vector<2x32xf32>
    %478 = math.exp %477 : vector<2x32xf32>
    %cst_99 = arith.constant 1.000000e+00 : f32
    %479 = vector.broadcast %cst_99 : f32 to vector<2x32xf32>
    %480 = arith.addf %479, %478 : vector<2x32xf32>
    %481 = arith.divf %479, %480 : vector<2x32xf32>
    %482 = arith.mulf %473, %455 : vector<2x32xf32>
    %483 = arith.mulf %467, %475 : vector<2x32xf32>
    %484 = arith.addf %482, %483 : vector<2x32xf32>
    %485 = math.tanh %484 : vector<2x32xf32>
    %486 = arith.mulf %481, %485 : vector<2x32xf32>
    %c14 = arith.constant 14 : index
    %c0_100 = arith.constant 0 : index
    %487 = vector.load %arg14[%c14, %c0_100] : memref<16x32xf32, #tpu.memory_space<vmem>>, vector<2x32xf32>
    tpu.vector_store %arg14[%c14, %c0_100], %486 {strides = array<i32>} : memref<16x32xf32, #tpu.memory_space<vmem>>, vector<2x32xf32>,
    %c0_101 = arith.constant 0 : index
    %c0_102 = arith.constant 0 : index
    %488 = vector.load %arg14[%c0_101, %c0_102] : memref<16x32xf32, #tpu.memory_space<vmem>>, vector<16x32xf32>
    %c0_103 = arith.constant 0 : index
    %c0_104 = arith.constant 0 : index
    %489 = vector.load %arg11[%c0_103, %c0_104] : memref<32x20xf32, #tpu.memory_space<vmem>>, vector<32x20xf32>
    %cst_105 = arith.constant dense<0.000000e+00> : vector<16x20xf32>
    %490 = tpu.matmul %488, %489, %cst_105 {dimension_numbers = #tpu.dot_dimension_numbers<[1], [0], [0], [1], [0, 0, 1, 1], [], []>} : vector<16x32xf32>, vector<32x20xf32>, vector<16x20xf32> -> vector<16x20xf32>
    %c0_106 = arith.constant 0 : index
    %c0_107 = arith.constant 0 : index
    %491 = vector.load %arg12[%c0_106, %c0_107] : memref<1x20xf32, #tpu.memory_space<vmem>>, vector<1x20xf32>
    %492 = vector.broadcast %491 : vector<1x20xf32> to vector<16x20xf32>
    %493 = arith.addf %490, %492 : vector<16x20xf32>
    %cst_108 = arith.constant dense<0xFF800000> : vector<16xf32>
    %494 = vector.multi_reduction <maximumf>, %493, %cst_108 [1] : vector<16x20xf32> to vector<16xf32>
    %495 = vector.shape_cast %494 : vector<16xf32> to vector<16x1xf32>
    %496 = vector.broadcast %495 : vector<16x1xf32> to vector<16x20xf32>
    %497 = arith.subf %493, %496 : vector<16x20xf32>
    %498 = math.exp %497 : vector<16x20xf32>
    %cst_109 = arith.constant dense<0.000000e+00> : vector<16xf32>
    %499 = vector.multi_reduction <add>, %498, %cst_109 [1] : vector<16x20xf32> to vector<16xf32>
    %500 = vector.shape_cast %499 : vector<16xf32> to vector<16x1xf32>
    %501 = math.log %500 : vector<16x1xf32>
    %502 = arith.addf %495, %501 : vector<16x1xf32>
    %503 = tpu.iota {dimensions = array<i32: 1>} : vector<16x20xi32>
    %c0_110 = arith.constant 0 : index
    %c0_111 = arith.constant 0 : index
    %504 = vector.load %arg2[%c0_110, %c0_111] : memref<16x1xi32, #tpu.memory_space<vmem>>, vector<16x1xi32>
    %505 = vector.broadcast %504 : vector<16x1xi32> to vector<16x20xi32>
    %506 = arith.cmpi eq, %503, %505 : vector<16x20xi32>
    %cst_112 = arith.constant 0.000000e+00 : f32
    %507 = vector.broadcast %cst_112 : f32 to vector<16x20xf32>
    %508 = arith.select %506, %493, %507 : vector<16x20xi1>, vector<16x20xf32>
    %cst_113 = arith.constant dense<0.000000e+00> : vector<16xf32>
    %509 = vector.multi_reduction <add>, %508, %cst_113 [1] : vector<16x20xf32> to vector<16xf32>
    %510 = vector.shape_cast %509 : vector<16xf32> to vector<16x1xf32>
    %511 = arith.subf %502, %510 : vector<16x1xf32>
    %512 = vector.shape_cast %511 : vector<16x1xf32> to vector<1x16x1xf32>
    %cst_114 = arith.constant dense<0.000000e+00> : vector<1xf32>
    %513 = vector.multi_reduction <add>, %512, %cst_114 [1, 2] : vector<1x16x1xf32> to vector<1xf32>
    %514 = vector.shape_cast %513 : vector<1xf32> to vector<1x1x1xf32>
    %515 = vector.extract %514[0, 0, 0] : f32 from vector<1x1x1xf32>
    %cst_115 = arith.constant 1.600000e+01 : f32
    %516 = arith.divf %515, %cst_115 : f32
    %517 = vector.broadcast %516 : f32 to vector<1x1xf32>
    %c0_116 = arith.constant 0 : index
    %c0_117 = arith.constant 0 : index
    %518 = vector.load %arg13[%c0_116, %c0_117] : memref<1x1xf32, #tpu.memory_space<vmem>>, vector<1x1xf32>
    tpu.vector_store %arg13[%c0_116, %c0_117], %517 {strides = array<i32>} : memref<1x1xf32, #tpu.memory_space<vmem>>, vector<1x1xf32>,
    return
  }
}

</mosaic_0001>

<bundles_post_ra>
// kernel: my_model_forward.1
= control target key start
LH: loop header
LB: loop body
LE: loop exit
PB: predicated region body
PF: predicated region fallthrough
CT: control target
= control target key end

     0   :  { %v2864_v2 = vmov 0   ;;  %s3377_s0 = inlined_call_operand.vmem [shape: s32[16,1], index: 0, kind: input, shape index: {}]   ;;  %s3378_s1 = inlined_call_operand.vmem [shape: s32[16,1], index: 1, kind: input, shape index: {}]   ;;  %s3379_s2 = inlined_call_operand.vmem [shape: s32[16,1], index: 2, kind: input, shape index: {}]   ;;  %s3380_s3 = inlined_call_operand.vmem [shape: f32[32,16], index: 3, kind: input, shape index: {}]   ;;  %s3381_s4 = inlined_call_operand.vmem [shape: f32[24,16], index: 4, kind: input, shape index: {}]   ;;  %s3382_s5 = inlined_call_operand.vmem [shape: f32[16,128], index: 5, kind: input, shape index: {}]   ;;  %s3383_s6 = inlined_call_operand.vmem [shape: f32[32,128], index: 6, kind: input, shape index: {}]   ;;  %s3384_s7 = inlined_call_operand.vmem [shape: f32[1,128], index: 7, kind: input, shape index: {}]   ;;  %s3385_s8 = inlined_call_operand.vmem [shape: f32[16,128], index: 8, kind: input, shape index: {}]   ;;  %s3386_s9 = inlined_call_operand.vmem [shape: f32[32,128], index: 9, kind: input, shape index: {}]   ;;  %s3387_s10 = inlined_call_operand.vmem [shape: f32[1,128], index: 10, kind: input, shape index: {}]   ;;  %s3388_s11 = inlined_call_operand.vmem [shape: f32[32,20], index: 11, kind: input, shape index: {}]   ;;  %s3389_s12 = inlined_call_operand.vmem [shape: f32[1,20], index: 12, kind: input, shape index: {}]   ;;  %s3390_s13 = inlined_call_operand.hbm [shape: f32[1,1], index: 13, kind: output, shape index: {}]  }
   0x1   :  { %v47_v0 = vld [vmem:[%s3377_s0] sm:$0xff]  ;;  %v62_v1 = vld [vmem:[%s3380_s3 + $0x18] sm:$0xff]  ;;  %2704 = vset.pattern.permute.xlu0 %v2864_v2  ;;  %v61_v3 = vld [vmem:[%s3380_s3 + $0x10] sm:$0xff] }
   0x2   :  { %2475 = vmatprep.subr.mxu0 %v62_v1  ;;  %50 = vperm.xlu0 %2704, %v47_v0   ;;  %v60_v4 = vld [vmem:[%s3380_s3 + $0x8] sm:$0xff] }
   0x3   :  { %2476 = vmatpush3.msra.mxu0 %v62_v1 }
   0x4   :  { %18 = vsyncpa [#allocation4], 0  ;;  %v48_v5 = vld [vmem:[%s3377_s0 + $0x8] sm:$0xff]  ;;  %2477 = vmatprep.subr.mxu0 %v61_v3  ;;  %2705 = vset.pattern.permute.xlu1 %v2864_v2  ;;  %v59_v6 = vld [vmem:[%s3380_s3] sm:$0xff]  ;;  %v2865_v13 = vmov 0.0   ;;  %v45_v14 = vlaneseq  ;;  %vm63_vm0 = vcmask 261120  }
   0x5   :  { %2478 = vmatpush3.msra.mxu0 %v61_v3  ;;  %v145_v7 = vld [vmem:[%s3378_s1] sm:$0xff]  ;;  %v159_v8 = vld [vmem:[%s3381_s4 + $0x10] sm:$0xff]  ;;  %v146_v9 = vld [vmem:[%s3378_s1 + $0x8] sm:$0xff]  ;;  %vm160_vm2 = vcmask 195584   ;;  %vm2866_vm6 = vmmov 0   ;;  %vm251_vm7 = vcmask 130048  }
   0x6   :  { %2479 = vmatprep.subr.mxu0 %v60_v4  ;;  %148 = vperm.xlu1 %2705, %v145_v7   ;;  %v158_v10 = vld [vmem:[%s3381_s4 + $0x8] sm:$0xff]  ;;  %v157_v12 = vld [vmem:[%s3381_s4] sm:$0xff]  ;;  %v2977_v15 = vand.u32 127, %v45_v14  ;;  %v2991_v23 = vld [vmem:[%s3383_s6 + $0x18] sm:$0xff]  ;;  %s2868_s25 = smov 32   ;;  %vm1381_vm8 = vcmask 254976  }
   0x7   :  { %53 = vperm.xlu0 %2704, %v48_v5   ;;  %2480 = vmatpush3.msra.mxu0 %v60_v4  ;;  %v243_v11 = vld [vmem:[%s3382_s5 + $0x8] sm:$0xff]  ;;  %v242_v25 = vld [vmem:[%s3382_s5] sm:$0xff]  ;;  %v3002_v26 = vld [vmem:[%s3383_s6 + $0x10] sm:$0xff]  ;;  %vm1490_vm9 = vcmask 257026   ;;  %vm1714_vm10 = vcmask 261126   ;;  %vm1602_vm11 = vcmask 259076  }
   0x8   :  { %2481 = vmatprep.subr.mxu0 %v59_v6  ;;  %2486 = vmatprep.subr.mxu1 %v159_v8  ;;  %v3009_v27 = vld [vmem:[%s3383_s6 + $0x8] sm:$0xff]  ;;  %v3016_v28 = vld [vmem:[%s3383_s6] sm:$0xff]  ;;  %vm2248_vm12 = vcmask 162816   ;;  %vm2293_vm15 = vcmask 7168  }
   0x9   :  { %2482 = vmatpush3.msra.mxu0 %v59_v6  ;;  %2487 = vmatpush3.msra.mxu1 %v159_v8  ;;  %v334_v29 = vld [vmem:[%s3385_s8 + $0x8] sm:$0xff]  ;;  %v333_v33 = vld [vmem:[%s3385_s8] sm:$0xff] }
   0xa   :  { %151 = vperm.xlu1 %2705, %v146_v9   ;;  %2488 = vmatprep.subr.mxu1 %v158_v10  ;;  %v2330_v37 = vld [vmem:[%s3384_s7] ss:$0 sm:$0xff]  ;;  %s2867_s7 = smov 64  }
   0xb   :  { %2489 = vmatpush3.msra.mxu1 %v158_v10  ;;  %2495 = vmatprep.subr.mxu0 %v243_v11  ;;  %v3061_v44 = vld [vmem:[%s3387_s10] ss:$0 sm:$0xff] }
   0xc   :  { %2490 = vmatprep.subr.mxu1 %v157_v12 }
   0xd   :  { %2491 = vmatpush3.msra.mxu1 %v157_v12 }
   0xe   :  { %2509 = vmatprep.subr.mxu1 %v2865_v13 }
  0x7d   :  { %v51_v16 = vpop.permute.xlu0 %50 }
  0x7e   :  { %vm55_vm1 = vcmp.eq.s32.totalorder %v2977_v15, %v51_v16 }
  0x7f   :  { %v57_v17 = vsel %vm55_vm1, 1.0, %v2865_v13 }
  0x80   :  { %2483 = vmatprep.mubr.msk.f32.mxu0 %vm63_vm0, %v57_v17 }
  0x81   :  { %v149_v18 = vpop.permute.xlu1 %148 }
  0x82   :  { %v54_v19 = vpop.permute.xlu0 %53  ;;  %vm153_vm3 = vcmp.eq.s32.totalorder %v2977_v15, %v149_v18 }
  0x83   :  { %vm56_vm4 = vcmp.eq.s32.totalorder %v2977_v15, %v54_v19  ;;  %v155_v20 = vsel %vm153_vm3, 1.0, %v2865_v13 }
  0x84   :  { %v58_v21 = vsel %vm56_vm4, 1.0, %v2865_v13  ;;  %2492 = vmatprep.mubr.msk.f32.mxu1 %vm160_vm2, %v155_v20 }
  0x85   :  { %2484 = vmatmul.mubr.msk.f32.vlgmr.msra.gmra.mxu0 %vm63_vm0, %v58_v21  ;;  %v152_v22 = vpop.permute.xlu1 %151 }
  0x86   :  { %vm154_vm5 = vcmp.eq.s32.totalorder %v2977_v15, %v152_v22  ;;  %2496 = vmatpush3.msra.mxu0 %v243_v11 }
  0x87   :  { %v156_v24 = vsel %vm154_vm5, 1.0, %v2865_v13  ;;  %2497 = vmatprep.subr.mxu0 %v242_v25 }
  0x88   :  { %2493 = vmatmul.mubr.msk.f32.vlgmr.msra.gmra.mxu1 %vm160_vm2, %v156_v24  ;;  %2498 = vmatpush3.msra.mxu0 %v242_v25 }
  0x89   :  { %2510 = vmatpush3.msra.mxu1 %v2991_v23  ;;  %2517 = vmatprep.mubr.msk.f32.mxu1 %vm2866_vm6, %v2865_v13 }
  0x8a   :  { %2511 = vmatprep.subr.mxu1 %v2865_v13  ;;  %2502 = vmatprep.subr.mxu0 %v334_v29 }
  0x8b   :  { %2512 = vmatpush3.msra.mxu1 %v3002_v26 }
  0x8c   :  { %2513 = vmatprep.subr.mxu1 %v2865_v13 }
  0x8d   :  { %2514 = vmatpush3.msra.mxu1 %v3009_v27 }
  0x8e   :  { %2515 = vmatprep.subr.mxu1 %v2865_v13 }
  0x8f   :  { %2516 = vmatpush3.msra.mxu1 %v3016_v28 }
  0x90   :  { %2518 = vmatmul.mubr.f32.vlgmr.msra.gmra.mxu1 %v2865_v13  ;;  %2531 = vmatprep.subr.mxu1 %v2865_v13 }
  0x91   :  { %2539 = vmatprep.mubr.msk.f32.mxu1 %vm2866_vm6, %v2865_v13  ;;  %2532 = vmatpush3.msra.mxu1 %v2991_v23 }
  0x92   :  { %2533 = vmatprep.subr.mxu1 %v2865_v13 }
  0x93   :  { %2534 = vmatpush3.msra.mxu1 %v3002_v26 }
  0x94   :  { %2535 = vmatprep.subr.mxu1 %v2865_v13 }
  0x95   :  { %2536 = vmatpush3.msra.mxu1 %v3009_v27 }
  0x96   :  { %2537 = vmatprep.subr.mxu1 %v2865_v13 }
  0x97   :  { %2538 = vmatpush3.msra.mxu1 %v3016_v28 }
  0x98   :  { %2553 = vmatprep.subr.mxu1 %v2865_v13 }
 0x145   :  { %v2485_v30 = vpop.f32.mrf.mxu0 }
 0x147   :  { %v136_v31 = vpop.f32.mrf.mxu0 }
 0x148   :  { %2499 = vmatprep.mubr.msk.f32.mxu0 %vm251_vm7, %v136_v31  ;;  %v2494_v32 = vpop.f32.mrf.mxu1 }
 0x149   :  { %2500 = vmatmul.mubr.msk.f32.vlgmr.msra.gmra.mxu0 %vm251_vm7, %v2485_v30 }
 0x14a   :  { %2503 = vmatpush3.msra.mxu0 %v334_v29  ;;  %v233_v34 = vpop.f32.mrf.mxu1 }
 0x14b   :  { %2504 = vmatprep.subr.mxu0 %v333_v33  ;;  %2506 = vmatprep.mubr.msk.f32.mxu0 %vm251_vm7, %v233_v34 }
 0x14c   :  { %2505 = vmatpush3.msra.mxu0 %v333_v33 }
 0x14d   :  { %2507 = vmatmul.mubr.msk.f32.vlgmr.msra.gmra.mxu0 %vm251_vm7, %v2494_v32  ;;  %2520 = vmatprep.subr.mxu0 %v2865_v13 }
 0x14e   :  { %2521 = vmatpush3.msra.mxu0 %v2991_v23  ;;  %2528 = vmatprep.mubr.msk.f32.mxu0 %vm2866_vm6, %v2865_v13 }
 0x14f   :  { %2522 = vmatprep.subr.mxu0 %v2865_v13 }
 0x150   :  { %2523 = vmatpush3.msra.mxu0 %v3002_v26  ;;  %v496_v35 = vpop.f32.mrf.mxu1 }
 0x151   :  { %2524 = vmatprep.subr.mxu0 %v2865_v13 }
 0x152   :  { %2525 = vmatpush3.msra.mxu0 %v3009_v27  ;;  %v2519_v36 = vpop.f32.mrf.mxu1 }
 0x153   :  { %2526 = vmatprep.subr.mxu0 %v2865_v13 }
 0x154   :  { %2527 = vmatpush3.msra.mxu0 %v3016_v28 }
 0x155   :  { %2542 = vmatprep.subr.mxu0 %v2865_v13 }
 0x209   :  { %v2501_v38 = vpop.f32.mrf.mxu0 }
 0x20a   :  { %v3053_v39 = vadd.f32 %v2501_v38, %v2330_v37 }
 0x20b   :  { %v324_v40 = vpop.f32.mrf.mxu0 }
 0x20c   :  { %v3055_v41 = vadd.f32 %v2330_v37, %v324_v40 }
 0x20d   :  { %v2508_v43 = vpop.f32.mrf.mxu0 }
 0x20e   :  { %v500_v42 = vadd.f32 %v496_v35, %v3055_v41  ;;  %v3064_v45 = vadd.f32 %v2508_v43, %v3061_v44 }
 0x20f   :  { %v3081_v60 = vpop.f32.mrf.mxu0 }
 0x210   :  { %2706 = vtanh.f32 %v500_v42  ;;  %v2336_v47 = vmul.f32 -1.442695, %v500_v42 }
 0x212   :  { %2708 = vpow2.f32 %v2336_v47 }
 0x21d   :  { %v2707_v46 = vpop.eup %2706 }
 0x21e   :  { %510 = vrot.lane.b32.xlu0 %v2707_v46, %s2867_s7 }
 0x21f   :  { %v2709_v48 = vpop.eup %2708 }
 0x220   :  { %v504_v49 = vadd.f32 1.0, %v2709_v48 }
 0x222   :  { %2710 = vrcp.f32 %v504_v49 }
 0x22f   :  { %v2711_v50 = vpop.eup %2710 }
 0x230   :  { %v508_v53 = vmul.f32 0.0, %v2711_v50 }
 0x290   :  { %v511_v51 = vpop.permute.xlu0 %510 }
 0x291   :  { %v513_v52 = vmul.f32 %v2711_v50, %v511_v51 }
 0x293   :  { %515 = vrot.lane.b32.xlu1 %v513_v52, %s2868_s25 }
 0x305   :  { %v516_v54 = vpop.permute.xlu1 %515 }
 0x306   :  { %v518_v55 = vadd.f32 %v516_v54, %v508_v53 }
 0x308   :  { %2712 = vtanh.f32 %v518_v55  ;;  %v612_v8 = vrot.slane %v518_v55, 6 }
 0x315   :  { %v2713_v56 = vpop.eup %2712 }
 0x316   :  { %521 = vrot.lane.b32.xlu0 %v2713_v56, %s2867_s7 }
 0x388   :  { %v522_v57 = vpop.permute.xlu0 %521 }
 0x389   :  { %v524_v58 = vmul.f32 %v2711_v50, %v522_v57 }
 0x38b   :  { %526 = vrot.lane.b32.xlu1 %v524_v58, %s2868_s25 }
 0x3fd   :  { %v527_v59 = vpop.permute.xlu1 %526 }
 0x3fe   :  { %2529 = vmatmul.mubr.msk.f32.vlgmr.msra.gmra.mxu0 %vm63_vm0, %v527_v59 }
 0x3ff   :  { %2543 = vmatpush3.msra.mxu0 %v2991_v23  ;;  %2550 = vmatprep.mubr.msk.f32.mxu0 %vm2866_vm6, %v2865_v13 }
 0x400   :  { %2544 = vmatprep.subr.mxu0 %v2865_v13 }
 0x401   :  { %2545 = vmatpush3.msra.mxu0 %v3002_v26 }
 0x402   :  { %2546 = vmatprep.subr.mxu0 %v2865_v13 }
 0x403   :  { %2547 = vmatpush3.msra.mxu0 %v3009_v27 }
 0x404   :  { %2548 = vmatprep.subr.mxu0 %v2865_v13 }
 0x405   :  { %2549 = vmatpush3.msra.mxu0 %v3016_v28 }
 0x406   :  { %2564 = vmatprep.subr.mxu0 %v2865_v13 }
 0x4be   :  { %v596_v61 = vpop.f32.mrf.mxu0 }
 0x4bf   :  { %v601_v62 = vrot.slane %v596_v61, 6 }
 0x4c0   :  { %v2530_v63 = vpop.f32.mrf.mxu0 }
 0x4c1   :  { %v603_v0 = vadd.f32 %v601_v62, %v3055_v41 }
 0x4c3   :  { %2714 = vtanh.f32 %v603_v0  ;;  %v2338_v2 = vmul.f32 -1.442695, %v603_v0 }
 0x4c5   :  { %2716 = vpow2.f32 %v2338_v2 }
 0x4d0   :  { %v2715_v1 = vpop.eup %2714 }
 0x4d1   :  { %616 = vrot.lane.b32.xlu0 %v2715_v1, %s2867_s7 }
 0x4d2   :  { %v2717_v3 = vpop.eup %2716 }
 0x4d3   :  { %v607_v4 = vadd.f32 1.0, %v2717_v3 }
 0x4d5   :  { %2718 = vrcp.f32 %v607_v4 }
 0x4e2   :  { %v2719_v5 = vpop.eup %2718 }
 0x4e3   :  { %v614_v9 = vmul.f32 %v2719_v5, %v612_v8 }
 0x543   :  { %v617_v6 = vpop.permute.xlu0 %616 }
 0x544   :  { %v619_v7 = vmul.f32 %v2719_v5, %v617_v6 }
 0x546   :  { %621 = vrot.lane.b32.xlu1 %v619_v7, %s2868_s25 }
 0x5b8   :  { %v622_v10 = vpop.permute.xlu1 %621 }
 0x5b9   :  { %v624_v11 = vadd.f32 %v622_v10, %v614_v9 }
 0x5bb   :  { %2720 = vtanh.f32 %v624_v11  ;;  %v719_v34 = vrot.slane %v624_v11, 6 }
 0x5c8   :  { %v2721_v12 = vpop.eup %2720 }
 0x5c9   :  { %627 = vrot.lane.b32.xlu0 %v2721_v12, %s2867_s7 }
 0x63b   :  { %v628_v14 = vpop.permute.xlu0 %627 }
 0x63c   :  { %v630_v16 = vmul.f32 %v2719_v5, %v628_v14 }
 0x63e   :  { %v632_v17 = vrot.slane %v630_v16, 2 }
 0x640   :  { %633 = vrot.lane.b32.xlu1 %v632_v17, %s2868_s25 }
 0x6b2   :  { %v634_v18 = vpop.permute.xlu1 %633 }
 0x6b3   :  { %2540 = vmatmul.mubr.msk.f32.vlgmr.msra.gmra.mxu1 %vm63_vm0, %v634_v18 }
 0x6b4   :  { %2554 = vmatpush3.msra.mxu1 %v2991_v23  ;;  %2561 = vmatprep.mubr.msk.f32.mxu1 %vm2866_vm6, %v2865_v13 }
 0x6b5   :  { %2555 = vmatprep.subr.mxu1 %v2865_v13 }
 0x6b6   :  { %2556 = vmatpush3.msra.mxu1 %v3002_v26 }
 0x6b7   :  { %2557 = vmatprep.subr.mxu1 %v2865_v13 }
 0x6b8   :  { %2558 = vmatpush3.msra.mxu1 %v3009_v27 }
 0x6b9   :  { %2559 = vmatprep.subr.mxu1 %v2865_v13 }
 0x6ba   :  { %2560 = vmatpush3.msra.mxu1 %v3016_v28 }
 0x6bb   :  { %2575 = vmatprep.subr.mxu1 %v2865_v13 }
 0x773   :  { %v703_v19 = vpop.f32.mrf.mxu1 }
 0x774   :  { %v708_v20 = vrot.slane %v703_v19, 4 }
 0x775   :  { %v2541_v21 = vpop.f32.mrf.mxu1 }
 0x776   :  { %v710_v22 = vadd.f32 %v708_v20, %v3055_v41 }
 0x778   :  { %2722 = vtanh.f32 %v710_v22  ;;  %v2340_v25 = vmul.f32 -1.442695, %v710_v22 }
 0x77a   :  { %2724 = vpow2.f32 %v2340_v25 }
 0x785   :  { %v2723_v24 = vpop.eup %2722 }
 0x786   :  { %723 = vrot.lane.b32.xlu0 %v2723_v24, %s2867_s7 }
 0x787   :  { %v2725_v29 = vpop.eup %2724 }
 0x788   :  { %v714_v30 = vadd.f32 1.0, %v2725_v29 }
 0x78a   :  { %2726 = vrcp.f32 %v714_v30 }
 0x797   :  { %v2727_v31 = vpop.eup %2726 }
 0x798   :  { %v721_v35 = vmul.f32 %v2727_v31, %v719_v34 }
 0x7f8   :  { %v724_v32 = vpop.permute.xlu0 %723 }
 0x7f9   :  { %v726_v33 = vmul.f32 %v2727_v31, %v724_v32 }
 0x7fb   :  { %728 = vrot.lane.b32.xlu1 %v726_v33, %s2868_s25 }
 0x86d   :  { %v729_v36 = vpop.permute.xlu1 %728 }
 0x86e   :  { %v731_v37 = vadd.f32 %v729_v36, %v721_v35 }
 0x870   :  { %2728 = vtanh.f32 %v731_v37  ;;  %v826_v58 = vrot.slane %v731_v37, 6 }
 0x87d   :  { %v2729_v38 = vpop.eup %2728 }
 0x87e   :  { %734 = vrot.lane.b32.xlu0 %v2729_v38, %s2867_s7 }
 0x8f0   :  { %v735_v40 = vpop.permute.xlu0 %734 }
 0x8f1   :  { %v737_v42 = vmul.f32 %v2727_v31, %v735_v40 }
 0x8f3   :  { %v739_v43 = vrot.slane %v737_v42, 4 }
 0x8f5   :  { %740 = vrot.lane.b32.xlu1 %v739_v43, %s2868_s25 }
 0x967   :  { %v741_v46 = vpop.permute.xlu1 %740 }
 0x968   :  { %2551 = vmatmul.mubr.msk.f32.vlgmr.msra.gmra.mxu0 %vm63_vm0, %v741_v46 }
 0x969   :  { %2565 = vmatpush3.msra.mxu0 %v2991_v23  ;;  %2572 = vmatprep.mubr.msk.f32.mxu0 %vm2866_vm6, %v2865_v13 }
 0x96a   :  { %2566 = vmatprep.subr.mxu0 %v2865_v13 }
 0x96b   :  { %2567 = vmatpush3.msra.mxu0 %v3002_v26 }
 0x96c   :  { %2568 = vmatprep.subr.mxu0 %v2865_v13 }
 0x96d   :  { %2569 = vmatpush3.msra.mxu0 %v3009_v27 }
 0x96e   :  { %2570 = vmatprep.subr.mxu0 %v2865_v13 }
 0x96f   :  { %2571 = vmatpush3.msra.mxu0 %v3016_v28 }
 0x970   :  { %2586 = vmatprep.subr.mxu0 %v2865_v13 }
 0xa28   :  { %v810_v47 = vpop.f32.mrf.mxu0 }
 0xa29   :  { %v815_v48 = vrot.slane %v810_v47, 2 }
 0xa2a   :  { %v2552_v49 = vpop.f32.mrf.mxu0 }
 0xa2b   :  { %v817_v50 = vadd.f32 %v815_v48, %v3055_v41 }
 0xa2d   :  { %2730 = vtanh.f32 %v817_v50  ;;  %v2342_v52 = vmul.f32 -1.442695, %v817_v50 }
 0xa2f   :  { %2732 = vpow2.f32 %v2342_v52 }
 0xa3a   :  { %v2731_v51 = vpop.eup %2730 }
 0xa3b   :  { %830 = vrot.lane.b32.xlu0 %v2731_v51, %s2867_s7 }
 0xa3c   :  { %v2733_v53 = vpop.eup %2732 }
 0xa3d   :  { %v821_v54 = vadd.f32 1.0, %v2733_v53 }
 0xa3f   :  { %2734 = vrcp.f32 %v821_v54 }
 0xa4c   :  { %v2735_v55 = vpop.eup %2734 }
 0xa4d   :  { %v828_v59 = vmul.f32 %v2735_v55, %v826_v58 }
 0xaad   :  { %v831_v56 = vpop.permute.xlu0 %830 }
 0xaae   :  { %v833_v57 = vmul.f32 %v2735_v55, %v831_v56 }
 0xab0   :  { %835 = vrot.lane.b32.xlu1 %v833_v57, %s2868_s25 }
 0xb22   :  { %v836_v61 = vpop.permute.xlu1 %835 }
 0xb23   :  { %v838_v62 = vadd.f32 %v836_v61, %v828_v59 }
 0xb25   :  { %2736 = vtanh.f32 %v838_v62  ;;  %v930_v14 = vrot.slane %v838_v62, 6 }
 0xb32   :  { %v2737_v41 = vpop.eup %2736 }
 0xb33   :  { %841 = vrot.lane.b32.xlu0 %v2737_v41, %s2867_s7 }
 0xba5   :  { %v842_v63 = vpop.permute.xlu0 %841 }
 0xba6   :  { %v844_v0 = vmul.f32 %v2735_v55, %v842_v63 }
 0xba8   :  { %v846_v1 = vrot.slane %v844_v0, 6 }
 0xbaa   :  { %847 = vrot.lane.b32.xlu1 %v846_v1, %s2868_s25 }
 0xc1c   :  { %v848_v2 = vpop.permute.xlu1 %847 }
 0xc1d   :  { %2562 = vmatmul.mubr.msk.f32.vlgmr.msra.gmra.mxu1 %vm63_vm0, %v848_v2 }
 0xc1e   :  { %2576 = vmatpush3.msra.mxu1 %v2991_v23  ;;  %2583 = vmatprep.mubr.msk.f32.mxu1 %vm2866_vm6, %v2865_v13 }
 0xc1f   :  { %2577 = vmatprep.subr.mxu1 %v2865_v13 }
 0xc20   :  { %2578 = vmatpush3.msra.mxu1 %v3002_v26 }
 0xc21   :  { %2579 = vmatprep.subr.mxu1 %v2865_v13 }
 0xc22   :  { %2580 = vmatpush3.msra.mxu1 %v3009_v27 }
 0xc23   :  { %2581 = vmatprep.subr.mxu1 %v2865_v13 }
 0xc24   :  { %2582 = vmatpush3.msra.mxu1 %v3016_v28 }
 0xc25   :  { %2597 = vmatprep.subr.mxu1 %v2865_v13 }
 0xcdd   :  { %v917_v3 = vpop.f32.mrf.mxu1 }
 0xcde   :  { %v921_v4 = vadd.f32 %v917_v3, %v3053_v39 }
 0xcdf   :  { %v2563_v5 = vpop.f32.mrf.mxu1 }
 0xce0   :  { %2738 = vtanh.f32 %v921_v4  ;;  %v2344_v7 = vmul.f32 -1.442695, %v921_v4 }
 0xce2   :  { %2740 = vpow2.f32 %v2344_v7 }
 0xced   :  { %v2739_v6 = vpop.eup %2738 }
 0xcee   :  { %934 = vrot.lane.b32.xlu0 %v2739_v6, %s2867_s7 }
 0xcef   :  { %v2741_v8 = vpop.eup %2740 }
 0xcf0   :  { %v925_v9 = vadd.f32 1.0, %v2741_v8 }
 0xcf2   :  { %2742 = vrcp.f32 %v925_v9 }
 0xcff   :  { %v2743_v10 = vpop.eup %2742 }
 0xd00   :  { %v932_v16 = vmul.f32 %v2743_v10, %v930_v14 }
 0xd60   :  { %v935_v11 = vpop.permute.xlu0 %934 }
 0xd61   :  { %v937_v12 = vmul.f32 %v2743_v10, %v935_v11 }
 0xd63   :  { %939 = vrot.lane.b32.xlu1 %v937_v12, %s2868_s25 }
 0xdd5   :  { %v940_v17 = vpop.permute.xlu1 %939 }
 0xdd6   :  { %v942_v18 = vadd.f32 %v940_v17, %v932_v16 }
 0xdd8   :  { %2744 = vtanh.f32 %v942_v18 }
 0xde5   :  { %v2745_v19 = vpop.eup %2744 }
 0xde6   :  { %945 = vrot.lane.b32.xlu0 %v2745_v19, %s2867_s7 }
 0xe58   :  { %v946_v20 = vpop.permute.xlu0 %945 }
 0xe59   :  { %v948_v21 = vmul.f32 %v2743_v10, %v946_v20  ;;  %v3174_v20 = vld [vmem:[%s3386_s9 + $0x10] sm:$0xff] }
 0xe5b   :  { %950 = vrot.lane.b32.xlu1 %v948_v21, %s2868_s25  ;;  %v3182_v21 = vld [vmem:[%s3386_s9 + $0x8] sm:$0xff] }
 0xecd   :  { %v951_v22 = vpop.permute.xlu1 %950 }
 0xece   :  { %2573 = vmatmul.mubr.msk.f32.vlgmr.msra.gmra.mxu0 %vm63_vm0, %v951_v22  ;;  %v3191_v22 = vld [vmem:[%s3386_s9] sm:$0xff] }
 0xecf   :  { %2587 = vmatpush3.msra.mxu0 %v2991_v23  ;;  %2594 = vmatprep.mubr.msk.f32.mxu0 %vm2866_vm6, %v2865_v13 }
 0xed0   :  { %2588 = vmatprep.subr.mxu0 %v2865_v13 }
 0xed1   :  { %2589 = vmatpush3.msra.mxu0 %v3002_v26 }
 0xed2   :  { %2590 = vmatprep.subr.mxu0 %v2865_v13 }
 0xed3   :  { %2591 = vmatpush3.msra.mxu0 %v3009_v27 }
 0xed4   :  { %2592 = vmatprep.subr.mxu0 %v2865_v13 }
 0xed5   :  { %2593 = vmatpush3.msra.mxu0 %v3016_v28  ;;  %v1036_v28 = vrot.slane %v942_v18, 6 }
 0xed6   :  { %2608 = vmatprep.subr.mxu0 %v2865_v13 }
 0xf8e   :  { %v1020_v24 = vpop.f32.mrf.mxu0 }
 0xf8f   :  { %v1025_v25 = vrot.slane %v1020_v24, 6 }
 0xf90   :  { %v2574_v23 = vpop.f32.mrf.mxu0 }
 0xf91   :  { %v1027_v29 = vadd.f32 %v1025_v25, %v3053_v39 }
 0xf93   :  { %2746 = vtanh.f32 %v1027_v29  ;;  %v2346_v26 = vmul.f32 -1.442695, %v1027_v29 }
 0xf95   :  { %2748 = vpow2.f32 %v2346_v26  ;;  %v3217_v26 = vadd.f32 %v3061_v44, %v3081_v60 }
 0xfa0   :  { %v2747_v30 = vpop.eup %2746 }
 0xfa1   :  { %1040 = vrot.lane.b32.xlu0 %v2747_v30, %s2867_s7 }
 0xfa2   :  { %v2749_v31 = vpop.eup %2748 }
 0xfa3   :  { %v1031_v32 = vadd.f32 1.0, %v2749_v31 }
 0xfa5   :  { %2750 = vrcp.f32 %v1031_v32 }
 0xfb2   :  { %v2751_v27 = vpop.eup %2750 }
 0xfb3   :  { %v1038_v35 = vmul.f32 %v2751_v27, %v1036_v28 }
0x1013   :  { %v1041_v33 = vpop.permute.xlu0 %1040 }
0x1014   :  { %v1043_v34 = vmul.f32 %v2751_v27, %v1041_v33 }
0x1016   :  { %1045 = vrot.lane.b32.xlu1 %v1043_v34, %s2868_s25 }
0x1088   :  { %v1046_v36 = vpop.permute.xlu1 %1045 }
0x1089   :  { %v1048_v37 = vadd.f32 %v1046_v36, %v1038_v35 }
0x108b   :  { %2752 = vtanh.f32 %v1048_v37  ;;  %v1143_v58 = vrot.slane %v1048_v37, 6 }
0x1098   :  { %v2753_v38 = vpop.eup %2752 }
0x1099   :  { %1051 = vrot.lane.b32.xlu0 %v2753_v38, %s2867_s7 }
0x110b   :  { %v1052_v40 = vpop.permute.xlu0 %1051 }
0x110c   :  { %v1054_v42 = vmul.f32 %v2751_v27, %v1052_v40 }
0x110e   :  { %v1056_v43 = vrot.slane %v1054_v42, 2 }
0x1110   :  { %1057 = vrot.lane.b32.xlu1 %v1056_v43, %s2868_s25 }
0x1182   :  { %v1058_v46 = vpop.permute.xlu1 %1057 }
0x1183   :  { %2584 = vmatmul.mubr.msk.f32.vlgmr.msra.gmra.mxu1 %vm63_vm0, %v1058_v46 }
0x1184   :  { %2605 = vmatprep.mubr.msk.f32.mxu1 %vm2866_vm6, %v2865_v13 }
0x1243   :  { %v1127_v47 = vpop.f32.mrf.mxu1 }
0x1244   :  { %v1132_v48 = vrot.slane %v1127_v47, 4 }
0x1245   :  { %v2585_v49 = vpop.f32.mrf.mxu1 }
0x1246   :  { %v1134_v50 = vadd.f32 %v1132_v48, %v3053_v39 }
0x1248   :  { %2754 = vtanh.f32 %v1134_v50  ;;  %v2348_v52 = vmul.f32 -1.442695, %v1134_v50 }
0x124a   :  { %2756 = vpow2.f32 %v2348_v52 }
0x1255   :  { %v2755_v51 = vpop.eup %2754 }
0x1256   :  { %1147 = vrot.lane.b32.xlu0 %v2755_v51, %s2867_s7 }
0x1257   :  { %v2757_v53 = vpop.eup %2756 }
0x1258   :  { %v1138_v54 = vadd.f32 1.0, %v2757_v53 }
0x125a   :  { %2758 = vrcp.f32 %v1138_v54 }
0x1267   :  { %v2759_v55 = vpop.eup %2758 }
0x1268   :  { %v1145_v59 = vmul.f32 %v2759_v55, %v1143_v58 }
0x12c8   :  { %v1148_v56 = vpop.permute.xlu0 %1147 }
0x12c9   :  { %v1150_v57 = vmul.f32 %v2759_v55, %v1148_v56 }
0x12cb   :  { %1152 = vrot.lane.b32.xlu1 %v1150_v57, %s2868_s25 }
0x133d   :  { %v1153_v61 = vpop.permute.xlu1 %1152 }
0x133e   :  { %v1155_v62 = vadd.f32 %v1153_v61, %v1145_v59 }
0x1340   :  { %2760 = vtanh.f32 %v1155_v62  ;;  %v1250_v16 = vrot.slane %v1155_v62, 6 }
0x134d   :  { %v2761_v41 = vpop.eup %2760 }
0x134e   :  { %1158 = vrot.lane.b32.xlu0 %v2761_v41, %s2867_s7 }
0x13c0   :  { %v1159_v63 = vpop.permute.xlu0 %1158 }
0x13c1   :  { %v1161_v0 = vmul.f32 %v2759_v55, %v1159_v63 }
0x13c3   :  { %v1163_v1 = vrot.slane %v1161_v0, 4 }
0x13c5   :  { %1164 = vrot.lane.b32.xlu1 %v1163_v1, %s2868_s25 }
0x1437   :  { %v1165_v2 = vpop.permute.xlu1 %1164 }
0x1438   :  { %2595 = vmatmul.mubr.msk.f32.vlgmr.msra.gmra.mxu0 %vm63_vm0, %v1165_v2 }
0x1439   :  { %2616 = vmatprep.mubr.msk.f32.mxu0 %vm2866_vm6, %v2865_v13 }
0x14f8   :  { %v1234_v3 = vpop.f32.mrf.mxu0 }
0x14f9   :  { %v1239_v4 = vrot.slane %v1234_v3, 2 }
0x14fa   :  { %v2596_v5 = vpop.f32.mrf.mxu0 }
0x14fb   :  { %v1241_v6 = vadd.f32 %v1239_v4, %v3053_v39  ;;  %v3169_v39 = vld [vmem:[%s3386_s9 + $0x18] sm:$0xff] }
0x14fc   :  { %2598 = vmatpush3.msra.mxu1 %v3169_v39  ;;  %2609 = vmatpush3.msra.mxu0 %v3169_v39 }
0x14fd   :  { %2762 = vtanh.f32 %v1241_v6  ;;  %v2350_v8 = vmul.f32 -1.442695, %v1241_v6  ;;  %2599 = vmatprep.subr.mxu1 %v2865_v13  ;;  %2610 = vmatprep.subr.mxu0 %v2865_v13 }
0x14fe   :  { %2600 = vmatpush3.msra.mxu1 %v3174_v20  ;;  %2611 = vmatpush3.msra.mxu0 %v3174_v20 }
0x14ff   :  { %2764 = vpow2.f32 %v2350_v8  ;;  %2601 = vmatprep.subr.mxu1 %v2865_v13  ;;  %2612 = vmatprep.subr.mxu0 %v2865_v13 }
0x1500   :  { %2602 = vmatpush3.msra.mxu1 %v3182_v21  ;;  %2613 = vmatpush3.msra.mxu0 %v3182_v21 }
0x1501   :  { %2603 = vmatprep.subr.mxu1 %v2865_v13  ;;  %2614 = vmatprep.subr.mxu0 %v2865_v13 }
0x1502   :  { %2604 = vmatpush3.msra.mxu1 %v3191_v22  ;;  %2615 = vmatpush3.msra.mxu0 %v3191_v22 }
0x1503   :  { %2619 = vmatprep.subr.mxu1 %v2865_v13  ;;  %2630 = vmatprep.subr.mxu0 %v2865_v13 }
0x150a   :  { %v2763_v7 = vpop.eup %2762 }
0x150b   :  { %1254 = vrot.lane.b32.xlu0 %v2763_v7, %s2867_s7 }
0x150c   :  { %v2765_v9 = vpop.eup %2764 }
0x150d   :  { %v1245_v10 = vadd.f32 1.0, %v2765_v9 }
0x150f   :  { %2766 = vrcp.f32 %v1245_v10 }
0x151c   :  { %v2767_v11 = vpop.eup %2766 }
0x151d   :  { %v1252_v17 = vmul.f32 %v2767_v11, %v1250_v16 }
0x157d   :  { %v1255_v12 = vpop.permute.xlu0 %1254 }
0x157e   :  { %v1257_v14 = vmul.f32 %v2767_v11, %v1255_v12 }
0x1580   :  { %1259 = vrot.lane.b32.xlu1 %v1257_v14, %s2868_s25 }
0x15f2   :  { %v1260_v18 = vpop.permute.xlu1 %1259 }
0x15f3   :  { %v1262_v19 = vadd.f32 %v1260_v18, %v1252_v17 }
0x15f5   :  { %2768 = vtanh.f32 %v1262_v19  ;;  %v1358_v44 = vrot.slane %v1262_v19, 6 }
0x1602   :  { %v2769_v24 = vpop.eup %2768 }
0x1603   :  { %1265 = vrot.lane.b32.xlu0 %v2769_v24, %s2867_s7 }
0x1675   :  { %v1266_v25 = vpop.permute.xlu0 %1265 }
0x1676   :  { %v1268_v23 = vmul.f32 %v2767_v11, %v1266_v25 }
0x1678   :  { %v1274_v29 = vrot.slane %v1268_v23, 6 }
0x167a   :  { %1275 = vrot.lane.b32.xlu1 %v1274_v29, %s2868_s25 }
0x16ec   :  { %v1276_v30 = vpop.permute.xlu1 %1275 }
0x16ed   :  { %2606 = vmatmul.mubr.msk.f32.vlgmr.msra.gmra.mxu1 %vm63_vm0, %v1276_v30 }
0x16ee   :  { %2620 = vmatpush3.msra.mxu1 %v3169_v39  ;;  %2627 = vmatprep.mubr.msk.f32.mxu1 %vm2866_vm6, %v2865_v13 }
0x16ef   :  { %2621 = vmatprep.subr.mxu1 %v2865_v13 }
0x16f0   :  { %2622 = vmatpush3.msra.mxu1 %v3174_v20 }
0x16f1   :  { %2623 = vmatprep.subr.mxu1 %v2865_v13 }
0x16f2   :  { %2624 = vmatpush3.msra.mxu1 %v3182_v21 }
0x16f3   :  { %2625 = vmatprep.subr.mxu1 %v2865_v13 }
0x16f4   :  { %2626 = vmatpush3.msra.mxu1 %v3191_v22 }
0x16f5   :  { %2641 = vmatprep.subr.mxu1 %v2865_v13 }
0x17ad   :  { %v1345_v31 = vpop.f32.mrf.mxu1 }
0x17ae   :  { %v1349_v32 = vadd.f32 %v1345_v31, %v3217_v26 }
0x17af   :  { %v2607_v27 = vpop.f32.mrf.mxu1 }
0x17b0   :  { %2770 = vtanh.f32 %v1349_v32  ;;  %v2352_v34 = vmul.f32 -1.442695, %v1349_v32 }
0x17b2   :  { %2772 = vpow2.f32 %v2352_v34 }
0x17bd   :  { %v2771_v33 = vpop.eup %2770 }
0x17be   :  { %1362 = vrot.lane.b32.xlu0 %v2771_v33, %s2867_s7 }
0x17bf   :  { %v2773_v28 = vpop.eup %2772 }
0x17c0   :  { %v1353_v35 = vadd.f32 1.0, %v2773_v28 }
0x17c2   :  { %2774 = vrcp.f32 %v1353_v35 }
0x17cf   :  { %v2775_v36 = vpop.eup %2774 }
0x17d0   :  { %v1360_v60 = vmul.f32 %v2775_v36, %v1358_v44 }
0x1830   :  { %v1363_v37 = vpop.permute.xlu0 %1362 }
0x1831   :  { %v1365_v38 = vmul.f32 %v2775_v36, %v1363_v37 }
0x1833   :  { %1367 = vrot.lane.b32.xlu1 %v1365_v38, %s2868_s25 }
0x18a5   :  { %v1368_v40 = vpop.permute.xlu1 %1367 }
0x18a6   :  { %v1370_v42 = vadd.f32 %v1368_v40, %v1360_v60 }
0x18a8   :  { %2776 = vtanh.f32 %v1370_v42  ;;  %v1467_v61 = vrot.slane %v1370_v42, 6 }
0x18b5   :  { %v2777_v43 = vpop.eup %2776 }
0x18b6   :  { %1373 = vrot.lane.b32.xlu0 %v2777_v43, %s2867_s7 }
0x1928   :  { %v1374_v46 = vpop.permute.xlu0 %1373 }
0x1929   :  { %v1376_v47 = vmul.f32 %v2775_v36, %v1374_v46 }
0x192b   :  { %1378 = vrot.lane.b32.xlu1 %v1376_v47, %s2868_s25 }
0x199d   :  { %v1379_v48 = vpop.permute.xlu1 %1378 }
0x199e   :  { %1382 = vst.msk [vmem:[#allocation2] sm:$0x3] %vm1381_vm8, %v1379_v48  ;;  %2617 = vmatmul.mubr.msk.f32.vlgmr.msra.gmra.mxu0 %vm63_vm0, %v1379_v48 }
0x199f   :  { %2631 = vmatpush3.msra.mxu0 %v3169_v39  ;;  %2638 = vmatprep.mubr.msk.f32.mxu0 %vm2866_vm6, %v2865_v13 }
0x19a0   :  { %2632 = vmatprep.subr.mxu0 %v2865_v13 }
0x19a1   :  { %2633 = vmatpush3.msra.mxu0 %v3174_v20 }
0x19a2   :  { %2634 = vmatprep.subr.mxu0 %v2865_v13 }
0x19a3   :  { %2635 = vmatpush3.msra.mxu0 %v3182_v21 }
0x19a4   :  { %2636 = vmatprep.subr.mxu0 %v2865_v13 }
0x19a5   :  { %2637 = vmatpush3.msra.mxu0 %v3191_v22 }
0x19a6   :  { %2652 = vmatprep.subr.mxu0 %v2865_v13 }
0x1a5e   :  { %v1451_v49 = vpop.f32.mrf.mxu0 }
0x1a5f   :  { %v1456_v50 = vrot.slane %v1451_v49, 6 }
0x1a60   :  { %v2618_v51 = vpop.f32.mrf.mxu0 }
0x1a61   :  { %v1458_v52 = vadd.f32 %v1456_v50, %v3217_v26 }
0x1a63   :  { %2778 = vtanh.f32 %v1458_v52  ;;  %v2354_v54 = vmul.f32 -1.442695, %v1458_v52 }
0x1a65   :  { %2780 = vpow2.f32 %v2354_v54 }
0x1a70   :  { %v2779_v53 = vpop.eup %2778 }
0x1a71   :  { %1471 = vrot.lane.b32.xlu0 %v2779_v53, %s2867_s7 }
0x1a72   :  { %v2781_v55 = vpop.eup %2780 }
0x1a73   :  { %v1462_v56 = vadd.f32 1.0, %v2781_v55 }
0x1a75   :  { %2782 = vrcp.f32 %v1462_v56 }
0x1a82   :  { %v2783_v57 = vpop.eup %2782 }
0x1a83   :  { %v1469_v62 = vmul.f32 %v2783_v57, %v1467_v61 }
0x1ae3   :  { %v1472_v58 = vpop.permute.xlu0 %1471 }
0x1ae4   :  { %v1474_v59 = vmul.f32 %v2783_v57, %v1472_v58 }
0x1ae6   :  { %1476 = vrot.lane.b32.xlu1 %v1474_v59, %s2868_s25 }
0x1b58   :  { %v1477_v41 = vpop.permute.xlu1 %1476 }
0x1b59   :  { %v1479_v63 = vadd.f32 %v1477_v41, %v1469_v62 }
0x1b5b   :  { %2784 = vtanh.f32 %v1479_v63  ;;  %v1579_v18 = vrot.slane %v1479_v63, 6 }
0x1b68   :  { %v2785_v0 = vpop.eup %2784 }
0x1b69   :  { %1482 = vrot.lane.b32.xlu0 %v2785_v0, %s2867_s7 }
0x1bdb   :  { %v1483_v1 = vpop.permute.xlu0 %1482 }
0x1bdc   :  { %v3240_v2 = vmul.f32 %v2783_v57, %v1483_v1 }
0x1bde   :  { %v1492_v3 = vrot.slane %v3240_v2, 2 }
0x1be0   :  { %1493 = vrot.lane.b32.xlu1 %v1492_v3, %s2868_s25 }
0x1c52   :  { %v1494_v4 = vpop.permute.xlu1 %1493 }
0x1c53   :  { %2628 = vmatmul.mubr.msk.f32.vlgmr.msra.gmra.mxu1 %vm63_vm0, %v1494_v4 }
0x1c54   :  { %2642 = vmatpush3.msra.mxu1 %v3169_v39  ;;  %2649 = vmatprep.mubr.msk.f32.mxu1 %vm2866_vm6, %v2865_v13 }
0x1c55   :  { %2643 = vmatprep.subr.mxu1 %v2865_v13 }
0x1c56   :  { %2644 = vmatpush3.msra.mxu1 %v3174_v20 }
0x1c57   :  { %2645 = vmatprep.subr.mxu1 %v2865_v13 }
0x1c58   :  { %2646 = vmatpush3.msra.mxu1 %v3182_v21 }
0x1c59   :  { %2647 = vmatprep.subr.mxu1 %v2865_v13 }
0x1c5a   :  { %2648 = vmatpush3.msra.mxu1 %v3191_v22 }
0x1c5b   :  { %2663 = vmatprep.subr.mxu1 %v2865_v13 }
0x1d13   :  { %v1563_v5 = vpop.f32.mrf.mxu1 }
0x1d14   :  { %v1568_v6 = vrot.slane %v1563_v5, 4 }
0x1d15   :  { %v2629_v7 = vpop.f32.mrf.mxu1 }
0x1d16   :  { %v1570_v8 = vadd.f32 %v1568_v6, %v3217_v26 }
0x1d18   :  { %2786 = vtanh.f32 %v1570_v8  ;;  %v2356_v10 = vmul.f32 -1.442695, %v1570_v8 }
0x1d1a   :  { %2788 = vpow2.f32 %v2356_v10 }
0x1d25   :  { %v2787_v9 = vpop.eup %2786 }
0x1d26   :  { %1583 = vrot.lane.b32.xlu0 %v2787_v9, %s2867_s7 }
0x1d27   :  { %v2789_v11 = vpop.eup %2788 }
0x1d28   :  { %v1574_v12 = vadd.f32 1.0, %v2789_v11 }
0x1d2a   :  { %2790 = vrcp.f32 %v1574_v12 }
0x1d37   :  { %v2791_v14 = vpop.eup %2790 }
0x1d38   :  { %v1581_v19 = vmul.f32 %v2791_v14, %v1579_v18 }
0x1d98   :  { %v1584_v16 = vpop.permute.xlu0 %1583 }
0x1d99   :  { %v1586_v17 = vmul.f32 %v2791_v14, %v1584_v16 }
0x1d9b   :  { %1588 = vrot.lane.b32.xlu1 %v1586_v17, %s2868_s25 }
0x1e0d   :  { %v1589_v24 = vpop.permute.xlu1 %1588 }
0x1e0e   :  { %v1591_v25 = vadd.f32 %v1589_v24, %v1581_v19 }
0x1e10   :  { %2792 = vtanh.f32 %v1591_v25  ;;  %v1691_v42 = vrot.slane %v1591_v25, 6 }
0x1e1d   :  { %v2793_v23 = vpop.eup %2792 }
0x1e1e   :  { %1594 = vrot.lane.b32.xlu0 %v2793_v23, %s2867_s7 }
0x1e90   :  { %v1595_v29 = vpop.permute.xlu0 %1594 }
0x1e91   :  { %v3259_v30 = vmul.f32 %v2791_v14, %v1595_v29 }
0x1e93   :  { %v1604_v31 = vrot.slane %v3259_v30, 4 }
0x1e95   :  { %1605 = vrot.lane.b32.xlu1 %v1604_v31, %s2868_s25 }
0x1f07   :  { %v1606_v32 = vpop.permute.xlu1 %1605 }
0x1f08   :  { %2639 = vmatmul.mubr.msk.f32.vlgmr.msra.gmra.mxu0 %vm63_vm0, %v1606_v32 }
0x1f09   :  { %2653 = vmatpush3.msra.mxu0 %v3169_v39  ;;  %2660 = vmatprep.mubr.msk.f32.mxu0 %vm2866_vm6, %v2865_v13 }
0x1f0a   :  { %2654 = vmatprep.subr.mxu0 %v2865_v13 }
0x1f0b   :  { %2655 = vmatpush3.msra.mxu0 %v3174_v20 }
0x1f0c   :  { %2656 = vmatprep.subr.mxu0 %v2865_v13 }
0x1f0d   :  { %2657 = vmatpush3.msra.mxu0 %v3182_v21 }
0x1f0e   :  { %2658 = vmatprep.subr.mxu0 %v2865_v13 }
0x1f0f   :  { %2659 = vmatpush3.msra.mxu0 %v3191_v22 }
0x1f10   :  { %2674 = vmatprep.subr.mxu0 %v2865_v13 }
0x1fc8   :  { %v1675_v27 = vpop.f32.mrf.mxu0 }
0x1fc9   :  { %v1680_v33 = vrot.slane %v1675_v27, 2 }
0x1fca   :  { %v2640_v34 = vpop.f32.mrf.mxu0 }
0x1fcb   :  { %v1682_v28 = vadd.f32 %v1680_v33, %v3217_v26 }
0x1fcd   :  { %2794 = vtanh.f32 %v1682_v28  ;;  %v2358_v36 = vmul.f32 -1.442695, %v1682_v28 }
0x1fcf   :  { %2796 = vpow2.f32 %v2358_v36 }
0x1fda   :  { %v2795_v35 = vpop.eup %2794 }
0x1fdb   :  { %1695 = vrot.lane.b32.xlu0 %v2795_v35, %s2867_s7 }
0x1fdc   :  { %v2797_v37 = vpop.eup %2796 }
0x1fdd   :  { %v1686_v38 = vadd.f32 1.0, %v2797_v37 }
0x1fdf   :  { %2798 = vrcp.f32 %v1686_v38 }
0x1fec   :  { %v2799_v44 = vpop.eup %2798 }
0x1fed   :  { %v1693_v43 = vmul.f32 %v2799_v44, %v1691_v42 }
0x204d   :  { %v1696_v60 = vpop.permute.xlu0 %1695 }
0x204e   :  { %v1698_v40 = vmul.f32 %v2799_v44, %v1696_v60 }
0x2050   :  { %1700 = vrot.lane.b32.xlu1 %v1698_v40, %s2868_s25 }
0x20c2   :  { %v1701_v46 = vpop.permute.xlu1 %1700 }
0x20c3   :  { %v1703_v47 = vadd.f32 %v1701_v46, %v1693_v43 }
0x20c5   :  { %2800 = vtanh.f32 %v1703_v47  ;;  %v1800_v41 = vrot.slane %v1703_v47, 6 }
0x20d2   :  { %v2801_v26 = vpop.eup %2800 }
0x20d3   :  { %1706 = vrot.lane.b32.xlu0 %v2801_v26, %s2867_s7 }
0x2145   :  { %v1707_v48 = vpop.permute.xlu0 %1706 }
0x2146   :  { %v3278_v49 = vmul.f32 %v2799_v44, %v1707_v48 }
0x2148   :  { %v1716_v50 = vrot.slane %v3278_v49, 6 }
0x214a   :  { %1717 = vrot.lane.b32.xlu1 %v1716_v50, %s2868_s25 }
0x21bc   :  { %v1718_v51 = vpop.permute.xlu1 %1717 }
0x21bd   :  { %2650 = vmatmul.mubr.msk.f32.vlgmr.msra.gmra.mxu1 %vm63_vm0, %v1718_v51 }
0x21be   :  { %2664 = vmatpush3.msra.mxu1 %v3169_v39  ;;  %2671 = vmatprep.mubr.msk.f32.mxu1 %vm2866_vm6, %v2865_v13 }
0x21bf   :  { %2665 = vmatprep.subr.mxu1 %v2865_v13 }
0x21c0   :  { %2666 = vmatpush3.msra.mxu1 %v3174_v20 }
0x21c1   :  { %2667 = vmatprep.subr.mxu1 %v2865_v13 }
0x21c2   :  { %2668 = vmatpush3.msra.mxu1 %v3182_v21 }
0x21c3   :  { %2669 = vmatprep.subr.mxu1 %v2865_v13 }
0x21c4   :  { %2670 = vmatpush3.msra.mxu1 %v3191_v22 }
0x227d   :  { %v1787_v52 = vpop.f32.mrf.mxu1 }
0x227e   :  { %v1791_v53 = vadd.f32 %v1787_v52, %v3064_v45 }
0x227f   :  { %v2651_v54 = vpop.f32.mrf.mxu1 }
0x2280   :  { %2802 = vtanh.f32 %v1791_v53  ;;  %v2360_v56 = vmul.f32 -1.442695, %v1791_v53 }
0x2282   :  { %2804 = vpow2.f32 %v2360_v56 }
0x228d   :  { %v2803_v55 = vpop.eup %2802 }
0x228e   :  { %1804 = vrot.lane.b32.xlu0 %v2803_v55, %s2867_s7 }
0x228f   :  { %v2805_v57 = vpop.eup %2804 }
0x2290   :  { %v1795_v58 = vadd.f32 1.0, %v2805_v57 }
0x2292   :  { %2806 = vrcp.f32 %v1795_v58 }
0x229f   :  { %v2807_v59 = vpop.eup %2806 }
0x22a0   :  { %v1802_v63 = vmul.f32 %v2807_v59, %v1800_v41 }
0x2300   :  { %v1805_v61 = vpop.permute.xlu0 %1804 }
0x2301   :  { %v1807_v62 = vmul.f32 %v2807_v59, %v1805_v61 }
0x2303   :  { %1809 = vrot.lane.b32.xlu1 %v1807_v62, %s2868_s25 }
0x2375   :  { %v1810_v0 = vpop.permute.xlu1 %1809 }
0x2376   :  { %v1812_v1 = vadd.f32 %v1810_v0, %v1802_v63 }
0x2378   :  { %2808 = vtanh.f32 %v1812_v1 }
0x2385   :  { %v2809_v3 = vpop.eup %2808 }
0x2386   :  { %1815 = vrot.lane.b32.xlu0 %v2809_v3, %s2867_s7 }
0x23f8   :  { %v1816_v4 = vpop.permute.xlu0 %1815 }
0x23f9   :  { %v1818_v5 = vmul.f32 %v2807_v59, %v1816_v4  ;;  %v2159_v4 = vld [vmem:[%s3388_s11 + $0x18] sm:$0xff] }
0x23fa   :  { %2685 = vmatprep.subr.mxu1 %v2159_v4 }
0x23fb   :  { %1820 = vrot.lane.b32.xlu1 %v1818_v5, %s2868_s25  ;;  %v2158_v5 = vld [vmem:[%s3388_s11 + $0x10] sm:$0xff] }
0x246d   :  { %v1821_v6 = vpop.permute.xlu1 %1820 }
0x246e   :  { %1823 = vst.msk [vmem:[#allocation2 + $0x8] sm:$0x3] %vm1381_vm8, %v1821_v6  ;;  %2661 = vmatmul.mubr.msk.f32.vlgmr.msra.gmra.mxu0 %vm63_vm0, %v1821_v6  ;;  %v2157_v6 = vld [vmem:[%s3388_s11 + $0x8] sm:$0xff] }
0x246f   :  { %2675 = vmatpush3.msra.mxu0 %v3169_v39  ;;  %2682 = vmatprep.mubr.msk.f32.mxu0 %vm2866_vm6, %v2865_v13 }
0x2470   :  { %2676 = vmatprep.subr.mxu0 %v2865_v13 }
0x2471   :  { %2677 = vmatpush3.msra.mxu0 %v3174_v20 }
0x2472   :  { %2678 = vmatprep.subr.mxu0 %v2865_v13 }
0x2473   :  { %2679 = vmatpush3.msra.mxu0 %v3182_v21 }
0x2474   :  { %2680 = vmatprep.subr.mxu0 %v2865_v13  ;;  %v1908_v13 = vrot.slane %v1812_v1, 6 }
0x2475   :  { %2681 = vmatpush3.msra.mxu0 %v3191_v22 }
0x252e   :  { %v1892_v7 = vpop.f32.mrf.mxu0 }
0x252f   :  { %v1897_v8 = vrot.slane %v1892_v7, 6 }
0x2530   :  { %v2662_v9 = vpop.f32.mrf.mxu0 }
0x2531   :  { %v1899_v39 = vadd.f32 %v1897_v8, %v3064_v45 }
0x2533   :  { %2810 = vtanh.f32 %v1899_v39  ;;  %v2362_v11 = vmul.f32 -1.442695, %v1899_v39 }
0x2535   :  { %2812 = vpow2.f32 %v2362_v11 }
0x2540   :  { %v2811_v10 = vpop.eup %2810 }
0x2541   :  { %1912 = vrot.lane.b32.xlu0 %v2811_v10, %s2867_s7 }
0x2542   :  { %v2813_v20 = vpop.eup %2812 }
0x2543   :  { %v1903_v12 = vadd.f32 1.0, %v2813_v20 }
0x2545   :  { %2814 = vrcp.f32 %v1903_v12  ;;  %v2367_v12 = vld [vmem:[%s3389_s12] ss:$0 sm:$0xff] }
0x2552   :  { %v2815_v14 = vpop.eup %2814 }
0x2553   :  { %v1910_v22 = vmul.f32 %v2815_v14, %v1908_v13 }
0x25b3   :  { %v1913_v21 = vpop.permute.xlu0 %1912 }
0x25b4   :  { %v1915_v16 = vmul.f32 %v2815_v14, %v1913_v21 }
0x25b6   :  { %1917 = vrot.lane.b32.xlu1 %v1915_v16, %s2868_s25 }
0x2628   :  { %v1918_v17 = vpop.permute.xlu1 %1917 }
0x2629   :  { %v1920_v18 = vadd.f32 %v1918_v17, %v1910_v22 }
0x262b   :  { %2816 = vtanh.f32 %v1920_v18  ;;  %v2019_v60 = vrot.slane %v1920_v18, 6  ;;  %v2274_v18 = vld [vmem:[%s3379_s2 + $0x8] sm:$0xff] }
0x2638   :  { %v2817_v19 = vpop.eup %2816 }
0x2639   :  { %1923 = vrot.lane.b32.xlu0 %v2817_v19, %s2867_s7  ;;  %v2273_v19 = vld [vmem:[%s3379_s2] sm:$0xff]  ;;  %s2869_s2 = smov [#allocation3]  }
0x263a   :  { %s2318_s12 = sshll.u32 %s2869_s2, 4  ;;  %s2319_s12 = int_to_ptr.vmem [resolvable:$true] %s2318_s12 }
0x263b   :  { %s2842_s0 = scalar_lea.vmem %s2319_s12, 16  ;;  %s2846_s24 = scalar_lea.vmem %s2319_s12, 32 }
0x263c   :  { %p2843_p0 = scmp.ne.s32.totalorder %s2319_s12, %s2842_s0  ;;  %p2847_p1 = scmp.lt.s32.totalorder %s2319_s12, %s2319_s12 }
0x263d   :  { %p2848_p2 = scmp.lt.s32.totalorder %s2846_s24, %s2842_s0 }
0x263f   :  { %p2849_p3 = por %p2848_p2, %p2847_p1 }
0x2641   :  { %p2850_p4 = pnand %p2849_p3, %p2843_p0 }
0x26ab   :  { %v1924_v24 = vpop.permute.xlu0 %1923 }
0x26ac   :  { %v3312_v25 = vmul.f32 %v2815_v14, %v1924_v24 }
0x26ae   :  { %v1932_v23 = vrot.slane %v3312_v25, 2 }
0x26b0   :  { %1933 = vrot.lane.b32.xlu1 %v1932_v23, %s2868_s25 }
0x2722   :  { %v1934_v29 = vpop.permute.xlu1 %1933 }
0x2723   :  { %2672 = vmatmul.mubr.msk.f32.vlgmr.msra.gmra.mxu1 %vm63_vm0, %v1934_v29 }
0x2724   :  { %2686 = vmatpush3.msra.mxu1 %v2159_v4 }
0x2725   :  { %2687 = vmatprep.subr.mxu1 %v2158_v5 }
0x2726   :  { %2688 = vmatpush3.msra.mxu1 %v2158_v5 }
0x2727   :  { %2689 = vmatprep.subr.mxu1 %v2157_v6 }
0x2728   :  { %2690 = vmatpush3.msra.mxu1 %v2157_v6 }
0x27e3   :  { %v2003_v31 = vpop.f32.mrf.mxu1 }
0x27e4   :  { %v2008_v32 = vrot.slane %v2003_v31, 4 }
0x27e5   :  { %v2673_v27 = vpop.f32.mrf.mxu1 }
0x27e6   :  { %v2010_v33 = vadd.f32 %v2008_v32, %v3064_v45 }
0x27e8   :  { %2818 = vtanh.f32 %v2010_v33  ;;  %v2364_v28 = vmul.f32 -1.442695, %v2010_v33 }
0x27ea   :  { %2820 = vpow2.f32 %v2364_v28 }
0x27f5   :  { %v2819_v34 = vpop.eup %2818 }
0x27f6   :  { %2023 = vrot.lane.b32.xlu0 %v2819_v34, %s2867_s7 }
0x27f7   :  { %v2821_v35 = vpop.eup %2820 }
0x27f8   :  { %v2014_v36 = vadd.f32 1.0, %v2821_v35 }
0x27fa   :  { %2822 = vrcp.f32 %v2014_v36 }
0x2807   :  { %v2823_v37 = vpop.eup %2822 }
0x2808   :  { %v2021_v40 = vmul.f32 %v2823_v37, %v2019_v60 }
0x2868   :  { %v2024_v38 = vpop.permute.xlu0 %2023 }
0x2869   :  { %v2026_v44 = vmul.f32 %v2823_v37, %v2024_v38 }
0x286b   :  { %2028 = vrot.lane.b32.xlu1 %v2026_v44, %s2868_s25 }
0x28dd   :  { %v2029_v42 = vpop.permute.xlu1 %2028 }
0x28de   :  { %v2031_v43 = vadd.f32 %v2029_v42, %v2021_v40 }
0x28e0   :  { %2824 = vtanh.f32 %v2031_v43 }
0x28ed   :  { %v2825_v46 = vpop.eup %2824 }
0x28ee   :  { %2034 = vrot.lane.b32.xlu0 %v2825_v46, %s2867_s7 }
0x2960   :  { %v2035_v47 = vpop.permute.xlu0 %2034 }
0x2961   :  { %v2037_v26 = vmul.f32 %v2823_v37, %v2035_v47 }
0x2963   :  { %v2043_v48 = vrot.slane %v2037_v26, 4 }
0x2965   :  { %2044 = vrot.lane.b32.xlu1 %v2043_v48, %s2868_s25 }
0x29d7   :  { %v2045_v50 = vpop.permute.xlu1 %2044 }
0x29d8   :  { %2683 = vmatmul.mubr.msk.f32.vlgmr.msra.gmra.mxu0 %vm63_vm0, %v2045_v50 }
0x2a98   :  { %v2114_v51 = vpop.f32.mrf.mxu0 }
0x2a99   :  { %v2119_v52 = vrot.slane %v2114_v51, 2 }
0x2a9a   :  { %v2684_v53 = vpop.f32.mrf.mxu0 }
0x2a9b   :  { %v2121_v54 = vadd.f32 %v2119_v52, %v3064_v45  ;;  %v2130_v45 = vrot.slane %v2031_v43, 6 }
0x2a9d   :  { %2826 = vtanh.f32 %v2121_v54  ;;  %v2366_v56 = vmul.f32 -1.442695, %v2121_v54 }
0x2a9f   :  { %2828 = vpow2.f32 %v2366_v56 }
0x2aaa   :  { %v2827_v55 = vpop.eup %2826 }
0x2aab   :  { %2134 = vrot.lane.b32.xlu0 %v2827_v55, %s2867_s7 }
0x2aac   :  { %v2829_v57 = vpop.eup %2828 }
0x2aad   :  { %v2125_v58 = vadd.f32 1.0, %v2829_v57 }
0x2aaf   :  { %2830 = vrcp.f32 %v2125_v58 }
0x2abc   :  { %v2831_v59 = vpop.eup %2830 }
0x2abd   :  { %v2132_v41 = vmul.f32 %v2831_v59, %v2130_v45 }
0x2b1d   :  { %v2135_v61 = vpop.permute.xlu0 %2134 }
0x2b1e   :  { %v2137_v62 = vmul.f32 %v2831_v59, %v2135_v61 }
0x2b20   :  { %2139 = vrot.lane.b32.xlu1 %v2137_v62, %s2868_s25 }
0x2b24   :  { %1487 = vrot.lane.b32.xlu1 %v3240_v2, %s2868_s25 }
0x2b28   :  { %1711 = vrot.lane.b32.xlu1 %v3278_v49, %s2868_s25 }
0x2b2c   :  { %2039 = vrot.lane.b32.xlu1 %v2037_v26, %s2868_s25 }
0x2b92   :  { %v2140_v63 = vpop.permute.xlu1 %2139 }
0x2b93   :  { %v2142_v0 = vadd.f32 %v2140_v63, %v2132_v41 }
0x2b95   :  { %2832 = vtanh.f32 %v2142_v0 }
0x2b96   :  { %v1488_v1 = vpop.permute.xlu1 %1487 }
0x2b97   :  { %1491 = vst.msk [vmem:[#allocation2] sm:$0xc] %vm1490_vm9, %v1488_v1 }
0x2b9a   :  { %v1712_v3 = vpop.permute.xlu1 %1711 }
0x2b9b   :  { %1715 = vst.msk [vmem:[#allocation2] sm:$0xc0] %vm1714_vm10, %v1712_v3 }
0x2b9e   :  { %v2040_v2 = vpop.permute.xlu1 %2039 }
0x2b9f   :  { %2042 = vst.msk [vmem:[#allocation2 + $0x8] sm:$0x30] %vm1602_vm11, %v2040_v2 }
0x2ba2   :  { %v2833_v49 = vpop.eup %2832 }
0x2ba3   :  { %2145 = vrot.lane.b32.xlu0 %v2833_v49, %s2867_s7 }
0x2ba7   :  { %1599 = vrot.lane.b32.xlu0 %v3259_v30, %s2868_s25  ;;  %v2156_v30 = vld [vmem:[%s3388_s11] sm:$0xff] }
0x2ba8   :  { %2691 = vmatprep.subr.mxu1 %v2156_v30 }
0x2ba9   :  { %2692 = vmatpush3.msra.mxu1 %v2156_v30 }
0x2bab   :  { %1928 = vrot.lane.b32.xlu0 %v3312_v25, %s2868_s25 }
0x2c15   :  { %v2146_v7 = vpop.permute.xlu0 %2145 }
0x2c16   :  { %v2148_v8 = vmul.f32 %v2831_v59, %v2146_v7 }
0x2c18   :  { %2150 = vrot.lane.b32.xlu0 %v2148_v8, %s2868_s25 }
0x2c19   :  { %v1600_v9 = vpop.permute.xlu0 %1599 }
0x2c1a   :  { %1603 = vst.msk [vmem:[#allocation2] sm:$0x30] %vm1602_vm11, %v1600_v9 }
0x2c1d   :  { %v1929_v39 = vpop.permute.xlu0 %1928 }
0x2c1e   :  { %1931 = vst.msk [vmem:[#allocation2 + $0x8] sm:$0xc] %vm1490_vm9, %v1929_v39 }
0x2c21   :  { %v2154_v10 = vld [vmem:[#allocation2] sm:$0xff] }
0x2c22   :  { %2693 = vmatprep.mubr.msk.f32.mxu1 %vm63_vm0, %v2154_v10 }
0x2c8a   :  { %v2151_v11 = vpop.permute.xlu0 %2150 }
0x2c8b   :  { %2153 = vst.msk [vmem:[#allocation2 + $0x8] sm:$0xc0] %vm1714_vm10, %v2151_v11 }
0x2c92   :  { %v2155_v20 = vld [vmem:[#allocation2 + $0x8] sm:$0xff] }
0x2c93   :  { %2694 = vmatmul.mubr.msk.f32.vlgmr.msra.gmra.mxu1 %vm63_vm0, %v2155_v20  ;;  %vm2310_vm0 = vcmask 0  }
0x2d53   :  { %v2695_v14 = vpop.f32.mrf.mxu1 }
0x2d54   :  { %v2245_v21 = vadd.f32 %v2695_v14, %v2367_v12 }
0x2d55   :  { %v2239_v16 = vpop.f32.mrf.mxu1 }
0x2d56   :  { %v2240_v13 = vadd.f32 %v2367_v12, %v2239_v16  ;;  %v2252_v22 = vsel %vm2248_vm12, %v2245_v21, -inf }
0x2d57   :  { %2253 = vmax.xlane.f32.xlu0 %v2252_v22 }
0x2d58   :  { %v2249_v17 = vsel %vm2248_vm12, %v2240_v13, -inf }
0x2d59   :  { %2250 = vmax.xlane.f32.xlu1 %v2249_v17 }
0x2d6a   :  { %2279 = vperm.xlu1 %2705, %v2274_v18  }
0x2d6d   :  { %2276 = vperm.xlu0 %2704, %v2273_v19  }
0x2de0   :  { %v2254_v24 = vpop.xlane.xlu0 %2253 }
0x2de1   :  { %v2256_v25 = vsub.f32 %v2245_v21, %v2254_v24 }
0x2de2   :  { %v2251_v23 = vpop.xlane.xlu1 %2250 }
0x2de3   :  { %v2259_v29 = vmul.f32 1.442695, %v2256_v25  ;;  %v2255_v31 = vsub.f32 %v2240_v13, %v2251_v23 }
0x2de5   :  { %2834 = vpow2.f32 %v2259_v29  ;;  %v2257_v32 = vmul.f32 1.442695, %v2255_v31 }
0x2de6   :  { %v2280_v33 = vpop.permute.xlu1 %2279 }
0x2de7   :  { %2836 = vpow2.f32 %v2257_v32  ;;  %vm2282_vm14 = vcmp.eq.s32.totalorder %v2977_v15, %v2280_v33 }
0x2de8   :  { %v2277_v27 = vpop.permute.xlu0 %2276  ;;  %v2284_v38 = vsel %vm2282_vm14, %v2245_v21, 0.0 }
0x2de9   :  { %vm2281_vm13 = vcmp.eq.s32.totalorder %v2977_v15, %v2277_v27  ;;  %v2288_v60 = vsel %vm2248_vm12, %v2284_v38, 0.0 }
0x2dea   :  { %v2283_v36 = vsel %vm2281_vm13, %v2240_v13, 0.0 }
0x2deb   :  { %v2285_v44 = vsel %vm2248_vm12, %v2283_v36, 0.0 }
0x2df2   :  { %v2835_v34 = vpop.eup %2834 }
0x2df3   :  { %v2264_v28 = vsel %vm2248_vm12, %v2835_v34, 0.0 }
0x2df4   :  { %v2837_v35 = vpop.eup %2836  ;;  %2265 = vadd.xlane.f32.xlu0 %v2264_v28 }
0x2df5   :  { %v2261_v37 = vsel %vm2248_vm12, %v2837_v35, 0.0 }
0x2df6   :  { %2262 = vadd.xlane.f32.xlu1 %v2261_v37 }
0x2df8   :  { %2286 = vadd.xlane.f32.xlu0 %v2285_v44 }
0x2dfa   :  { %2289 = vadd.xlane.f32.xlu1 %v2288_v60 }
0x2e7d   :  { %v2266_v40 = vpop.xlane.xlu0 %2265 }
0x2e7e   :  { %2838 = vlog2.f32 %v2266_v40 }
0x2e7f   :  { %v2263_v42 = vpop.xlane.xlu1 %2262 }
0x2e80   :  { %2840 = vlog2.f32 %v2263_v42 }
0x2e81   :  { %v2287_v52 = vpop.xlane.xlu0 %2286 }
0x2e83   :  { %v2290_v48 = vpop.xlane.xlu1 %2289 }
0x2e8b   :  { %v2839_v15 = vpop.eup %2838 }
0x2e8c   :  { %v2270_v43 = vmul.f32 0.6931472, %v2839_v15 }
0x2e8d   :  { %v2841_v46 = vpop.eup %2840 }
0x2e8e   :  { %v2268_v47 = vmul.f32 0.6931472, %v2841_v46  ;;  %v2272_v26 = vadd.f32 %v2270_v43, %v2254_v24 }
0x2e90   :  { %v2271_v50 = vadd.f32 %v2268_v47, %v2251_v23  ;;  %v2292_v51 = vsub.f32 %v2272_v26, %v2290_v48 }
0x2e92   :  { %v2291_v53 = vsub.f32 %v2271_v50, %v2287_v52  ;;  %v2295_v55 = vsel %vm2293_vm15, %v2292_v51, 0.0 }
0x2e94   :  { %v2294_v54 = vsel %vm2293_vm15, %v2291_v53, 0.0 }
0x2e95   :  { %v2296_v56 = vadd.f32 %v2295_v55, %v2294_v54 }
0x2e97   :  { %2297 = vadd.xlane.f32.xlu0 %v2296_v56 }
0x2f20   :  { %v2298_v57 = vpop.xlane.xlu0 %2297 }
0x2f21   :  { %v2299_v58 = vrot.slane %v2298_v57, 4 }
0x2f23   :  { %v2300_v59 = vadd.f32 %v2299_v58, %v2298_v57 }
0x2f25   :  { %v2301_v61 = vrot.slane %v2300_v59, 2 }
0x2f27   :  { %v2302_v62 = vadd.f32 %v2301_v61, %v2300_v59 }
0x2f29   :  { %v2303_v45 = vrot.slane %v2302_v62, 1 }
0x2f2b   :  { %v2304_v41 = vadd.f32 %v2303_v45, %v2302_v62 }
0x2f2d   :  { %2696 = vpush %v2304_v41 }
0x2f5e   :  { %s2697_s8 = spop %2696 }
0x2f5f   :  { %s2308_s23 = smul.f32 0.0625, %s2697_s8 }
0x2f61   :  { %v2309_v63 = vstv %s2308_s23 }
0x2f62   :  { %2311 = vst.msk [vmem:[#allocation3] sm:$0x1] %vm2310_vm0, %v2309_v63 }
0x2f63   :  { %2853 = shalt.err (!%p2850_p4)
}
0x2f64   :  { %2321 = dma.vmem_to_hbm [thread:$0]  %s2319_s12, 16, %s3390_s13, [#allocation4]  }
0x2f65   :  { %2862 = dma.done.wait [#allocation4], 16  }
0x2f66   :  { %2863 = vsyncadd [#allocation4], 4294967280 }
0x2f67   :  { %2325 = vsyncpa [#allocation4], 1 }

</bundles_post_ra>
